<compile_context>
chip_gen: v7x
topology: tpu7x:2x2x1
jax: 0.10.0
libtpu: 0.0.40
codegen_flags: <defaults>
</compile_context>

<pallas_src>
import functools
import math

import jax
import jax.numpy as jnp
from jax.experimental import pallas as pl
from jax.experimental.pallas import tpu as pltpu

_BN_EPS = 1e-5


# ----------------------------------------------------------------------------
# Fused GhostModule kernel (one grid step == one batch image)
# ----------------------------------------------------------------------------
def _ghost_fused_kernel(x_ref, wpw_ref, b1_ref, wdw_ref, b2_ref, e1_ref, e2_ref,
                        o_ref, xp_ref, *, H, W):
    C1 = wpw_ref.shape[1]

    # ---- primary 1x1 conv (BN1 scale pre-folded into wpw) -> x1, stays in VMEM ----
    x1 = jnp.dot(x_ref[0], wpw_ref[...],
                 preferred_element_type=jnp.float32) + b1_ref[...]          # (H*W, C1)
    x1_hw = x1.reshape(H, W, C1)

    # ---- depthwise 3x3, pad=1 (halo lives in VMEM scratch, never in HBM) ----
    PAD = 8                                    # sublane-aligned interior origin
    xp_ref[...] = jnp.zeros_like(xp_ref)       # zero halo (+interior, cheap)
    xp_ref[1:H + 1, PAD:PAD + W, :] = x1_hw    # aligned interior write

    wdw = wdw_ref[...]                         # (9, C1), loaded once per step
    acc = jnp.zeros((H, W, C1), jnp.float32)
    for dy in range(3):
        for dx in range(3):
            k = 3 * dy + dx
            acc = acc + (xp_ref[dy:dy + H, PAD - 1 + dx:PAD - 1 + dx + W, :]
                         * wdw[k:k + 1, :])
    x2 = (acc + b2_ref[...]).reshape(H * W, C1)

    # ---- concat([x1, x2], ch)[..., :oup] as placement matmuls; one dense store ----
    o_ref[0] = (jnp.dot(x1, e1_ref[...], preferred_element_type=jnp.float32) +
                jnp.dot(x2, e2_ref[...], preferred_element_type=jnp.float32))


def ghost_module_forward(x_nchw, p):
    """NCHW in, NCHW out (PyTorch convention); runs the fused Pallas kernel."""
    x = jnp.transpose(x_nchw, (0, 2, 3, 1)).astype(jnp.float32)   # -> NHWC
    if p["stride"] > 1:          # 1x1 conv, pad 0: stride == spatial subsample
        x = x[:, ::p["stride"], ::p["stride"], :]
    n, h, w, cin = x.shape
    c1, oup = p["init_c"], p["oup"]
    xf = x.reshape(n, h * w, cin)

    kernel = functools.partial(_ghost_fused_kernel, H=h, W=w)
    out = pl.pallas_call(
        kernel,
        out_shape=jax.ShapeDtypeStruct((n, h * w, oup), jnp.float32),
        grid=(n,),
        in_specs=[
            pl.BlockSpec((1, h * w, cin), lambda i: (i, 0, 0)),   # x (per image)
            pl.BlockSpec((cin, c1), lambda i: (0, 0)),            # w_pw (BN1 folded)
            pl.BlockSpec((1, c1), lambda i: (0, 0)),              # b1
            pl.BlockSpec((9, c1), lambda i: (0, 0)),              # w_dw (BN2 folded)
            pl.BlockSpec((1, c1), lambda i: (0, 0)),              # b2
            pl.BlockSpec((c1, oup), lambda i: (0, 0)),            # E1 placement
            pl.BlockSpec((c1, oup), lambda i: (0, 0)),            # E2 placement
        ],
        out_specs=pl.BlockSpec((1, h * w, oup), lambda i: (i, 0, 0)),
        scratch_shapes=[pltpu.VMEM((h + 2, w + 16, c1), jnp.float32)],
        compiler_params=pltpu.CompilerParams(dimension_semantics=("parallel",)),
    )(xf, p["w_pw"], p["b1"], p["w_dw"], p["b2"], p["e1"], p["e2"])

    out = out.reshape(n, h, w, oup)
    return jnp.transpose(out, (0, 3, 1, 2))                      # -> NCHW


# ----------------------------------------------------------------------------
# Parameter construction (deterministic, synthetic) with BN folding
# ----------------------------------------------------------------------------
def _bn_scale_bias(keys, c):
    kg, kb, km, kv = keys
    gamma = jax.random.uniform(kg, (c,), minval=0.5, maxval=1.5)
    beta = jax.random.normal(kb, (c,)) * 0.1
    mean = jax.random.normal(km, (c,)) * 0.1
    var = jax.random.uniform(kv, (c,), minval=0.5, maxval=1.5)
    scale = gamma / jnp.sqrt(var + _BN_EPS)
    bias = beta - mean * scale
    return scale.astype(jnp.float32), bias.astype(jnp.float32)


def make_ghost_module_params(key, inp, oup, stride=1):
    init_c = math.ceil(oup / 2)          # ratio = 2  ->  new_channels == init_channels
    ks = jax.random.split(key, 10)
    w_primary = (jax.random.normal(ks[0], (inp, init_c)) * 0.1).astype(jnp.float32)
    # depthwise 3x3 weights: (9, init_c); [3*dy+dx, c] == torch_weight[c, 0, dy, dx]
    w_cheap = (jax.random.normal(ks[1], (9, init_c)) * 0.1).astype(jnp.float32)
    s1, b1 = _bn_scale_bias(ks[2:6], init_c)
    s2, b2 = _bn_scale_bias(ks[6:10], init_c)

    # Fold BN scales into the conv weights (exact for inference-mode BN).
    w_pw = w_primary * s1[None, :]
    w_dw = w_cheap * s2[None, :]

    # concat([x1, x2], ch)[..., :oup]  ==  x1 @ E1 + x2 @ E2
    c2 = oup - init_c
    e1 = jnp.eye(init_c, oup, dtype=jnp.float32)
    e2 = jnp.zeros((init_c, oup), jnp.float32).at[:c2, init_c:].set(
        jnp.eye(c2, dtype=jnp.float32))

    return dict(
        oup=oup, init_c=init_c, stride=stride,
        w_pw=w_pw, b1=b1.reshape(1, init_c),
        w_dw=w_dw, b2=b2.reshape(1, init_c),
        e1=e1, e2=e2,
        # raw (unfolded) parameters kept for the XLA reference check
        raw_w_primary=w_primary, raw_w_cheap=w_cheap,
        raw_s1=s1, raw_b1=b1, raw_s2=s2, raw_b2=b2,
    )


# ----------------------------------------------------------------------------
# Plain-XLA reference (unfolded params) mirroring the PyTorch module exactly
# ----------------------------------------------------------------------------
def ghost_module_reference(x_nchw, p):
    s = p["stride"]
    c1 = p["init_c"]
    x = jnp.transpose(x_nchw, (0, 2, 3, 1)).astype(jnp.float32)            # NHWC
    w1 = p["raw_w_primary"].reshape(1, 1, x.shape[-1], c1)                 # HWIO
    x1 = jax.lax.conv_general_dilated(
        x, w1, (s, s), "VALID", dimension_numbers=("NHWC", "HWIO", "NHWC"))
    x1 = x1 * p["raw_s1"] + p["raw_b1"]
    w2 = p["raw_w_cheap"].reshape(3, 3, 1, c1)                             # depthwise HWIO
    x2 = jax.lax.conv_general_dilated(
        x1, w2, (1, 1), ((1, 1), (1, 1)),
        dimension_numbers=("NHWC", "HWIO", "NHWC"), feature_group_count=c1)
    x2 = x2 * p["raw_s2"] + p["raw_b2"]
    out = jnp.concatenate([x1, x2], axis=-1)[..., :p["oup"]]
    return jnp.transpose(out, (0, 3, 1, 2))                                # NCHW


if __name__ == "__main__":
    key = jax.random.PRNGKey(0)
    kx, kp = jax.random.split(key)

    # Small deterministic config: GhostModule(inp=4, oup=8) on 2x4x16x16 input.
    batch, inp, oup, hw = 2, 4, 8, 16
    x = jax.random.normal(kx, (batch, inp, hw, hw), dtype=jnp.float32)     # NCHW
    params = make_ghost_module_params(kp, inp, oup, stride=1)

    y = ghost_module_forward(x, params)
    jax.block_until_ready(y)
    assert y.shape == (batch, oup, hw, hw)

    # Correctness cross-check against a plain-XLA reference (unfolded BN path).
    y_ref = ghost_module_reference(x, params)
    assert jnp.allclose(y, y_ref, atol=1e-4, rtol=1e-4), \
        float(jnp.max(jnp.abs(y - y_ref)))

    print("KERNEL_OK")
</pallas_src>

<mosaic_0001>
module attributes {stable_mosaic.version = 11 : i64} {
  func.func @_ghost_fused_kernel(%arg0: i32, %arg1: memref<1x256x4xf32, #tpu.memory_space<vmem>>, %arg2: memref<4x4xf32, #tpu.memory_space<vmem>>, %arg3: memref<1x4xf32, #tpu.memory_space<vmem>>, %arg4: memref<9x4xf32, #tpu.memory_space<vmem>>, %arg5: memref<1x4xf32, #tpu.memory_space<vmem>>, %arg6: memref<4x8xf32, #tpu.memory_space<vmem>>, %arg7: memref<4x8xf32, #tpu.memory_space<vmem>>, %arg8: memref<1x256x8xf32, #tpu.memory_space<vmem>>, %arg9: memref<18x32x4xf32, #tpu.memory_space<vmem>>) attributes {dimension_semantics = [#tpu.dimension_semantics<parallel>], iteration_bounds = array<i64: 2>, scalar_prefetch = 0 : i64, scratch_operands = 1 : i64, tpu.core_type = #tpu.core_type<tc>, window_params = [{transform_indices = @transform_0, window_bounds = array<i64: 1, 256, 4>}, {pipeline_mode = #tpu.pipeline_mode<synchronous>, transform_indices = @transform_1, window_bounds = array<i64: 4, 4>}, {pipeline_mode = #tpu.pipeline_mode<synchronous>, transform_indices = @transform_2, window_bounds = array<i64: 1, 4>}, {pipeline_mode = #tpu.pipeline_mode<synchronous>, transform_indices = @transform_3, window_bounds = array<i64: 9, 4>}, {pipeline_mode = #tpu.pipeline_mode<synchronous>, transform_indices = @transform_4, window_bounds = array<i64: 1, 4>}, {pipeline_mode = #tpu.pipeline_mode<synchronous>, transform_indices = @transform_5, window_bounds = array<i64: 4, 8>}, {pipeline_mode = #tpu.pipeline_mode<synchronous>, transform_indices = @transform_6, window_bounds = array<i64: 4, 8>}, {transform_indices = @transform_7, window_bounds = array<i64: 1, 256, 8>}]} {
    %c0 = arith.constant 0 : index
    %c0_0 = arith.constant 0 : index
    %c0_1 = arith.constant 0 : index
    %0 = vector.load %arg1[%c0, %c0_0, %c0_1] : memref<1x256x4xf32, #tpu.memory_space<vmem>>, vector<1x256x4xf32>
    %1 = vector.shape_cast %0 : vector<1x256x4xf32> to vector<256x4xf32>
    %c0_2 = arith.constant 0 : index
    %c0_3 = arith.constant 0 : index
    %2 = vector.load %arg2[%c0_2, %c0_3] : memref<4x4xf32, #tpu.memory_space<vmem>>, vector<4x4xf32>
    %cst = arith.constant dense<0.000000e+00> : vector<256x4xf32>
    %3 = tpu.matmul %1, %2, %cst {dimension_numbers = #tpu.dot_dimension_numbers<[1], [0], [0], [1], [0, 0, 1, 1], [], []>} : vector<256x4xf32>, vector<4x4xf32>, vector<256x4xf32> -> vector<256x4xf32>
    %c0_4 = arith.constant 0 : index
    %c0_5 = arith.constant 0 : index
    %4 = vector.load %arg3[%c0_4, %c0_5] : memref<1x4xf32, #tpu.memory_space<vmem>>, vector<1x4xf32>
    %5 = vector.broadcast %4 : vector<1x4xf32> to vector<256x4xf32>
    %6 = arith.addf %3, %5 : vector<256x4xf32>
    %7 = vector.shape_cast %6 : vector<256x4xf32> to vector<16x16x4xf32>
    %cst_6 = arith.constant 0.000000e+00 : f32
    %8 = vector.broadcast %cst_6 : f32 to vector<18x32x4xf32>
    %c0_7 = arith.constant 0 : index
    %c0_8 = arith.constant 0 : index
    %c0_9 = arith.constant 0 : index
    %9 = vector.load %arg9[%c0_7, %c0_8, %c0_9] : memref<18x32x4xf32, #tpu.memory_space<vmem>>, vector<18x32x4xf32>
    tpu.vector_store %arg9[%c0_7, %c0_8, %c0_9], %8 {strides = array<i32>} : memref<18x32x4xf32, #tpu.memory_space<vmem>>, vector<18x32x4xf32>,
    %c1 = arith.constant 1 : index
    %c8 = arith.constant 8 : index
    %c0_10 = arith.constant 0 : index
    %10 = vector.load %arg9[%c1, %c8, %c0_10] : memref<18x32x4xf32, #tpu.memory_space<vmem>>, vector<16x16x4xf32>
    tpu.vector_store %arg9[%c1, %c8, %c0_10], %7 {strides = array<i32>} : memref<18x32x4xf32, #tpu.memory_space<vmem>>, vector<16x16x4xf32>,
    %c0_11 = arith.constant 0 : index
    %c0_12 = arith.constant 0 : index
    %11 = vector.load %arg4[%c0_11, %c0_12] : memref<9x4xf32, #tpu.memory_space<vmem>>, vector<9x4xf32>
    %cst_13 = arith.constant 0.000000e+00 : f32
    %12 = vector.broadcast %cst_13 : f32 to vector<16x16x4xf32>
    %c0_14 = arith.constant 0 : index
    %c7 = arith.constant 7 : index
    %c0_15 = arith.constant 0 : index
    %13 = vector.load %arg9[%c0_14, %c7, %c0_15] : memref<18x32x4xf32, #tpu.memory_space<vmem>>, vector<16x16x4xf32>
    %14 = vector.extract_strided_slice %11 {offsets = [0, 0], sizes = [1, 4], strides = [1, 1]} : vector<9x4xf32> to vector<1x4xf32>
    %15 = vector.shape_cast %14 : vector<1x4xf32> to vector<1x1x4xf32>
    %16 = vector.broadcast %15 : vector<1x1x4xf32> to vector<16x16x4xf32>
    %17 = arith.mulf %13, %16 : vector<16x16x4xf32>
    %18 = arith.addf %12, %17 : vector<16x16x4xf32>
    %c0_16 = arith.constant 0 : index
    %c8_17 = arith.constant 8 : index
    %c0_18 = arith.constant 0 : index
    %19 = vector.load %arg9[%c0_16, %c8_17, %c0_18] : memref<18x32x4xf32, #tpu.memory_space<vmem>>, vector<16x16x4xf32>
    %20 = vector.extract_strided_slice %11 {offsets = [1, 0], sizes = [1, 4], strides = [1, 1]} : vector<9x4xf32> to vector<1x4xf32>
    %21 = vector.shape_cast %20 : vector<1x4xf32> to vector<1x1x4xf32>
    %22 = vector.broadcast %21 : vector<1x1x4xf32> to vector<16x16x4xf32>
    %23 = arith.mulf %19, %22 : vector<16x16x4xf32>
    %24 = arith.addf %18, %23 : vector<16x16x4xf32>
    %c0_19 = arith.constant 0 : index
    %c9 = arith.constant 9 : index
    %c0_20 = arith.constant 0 : index
    %25 = vector.load %arg9[%c0_19, %c9, %c0_20] : memref<18x32x4xf32, #tpu.memory_space<vmem>>, vector<16x16x4xf32>
    %26 = vector.extract_strided_slice %11 {offsets = [2, 0], sizes = [1, 4], strides = [1, 1]} : vector<9x4xf32> to vector<1x4xf32>
    %27 = vector.shape_cast %26 : vector<1x4xf32> to vector<1x1x4xf32>
    %28 = vector.broadcast %27 : vector<1x1x4xf32> to vector<16x16x4xf32>
    %29 = arith.mulf %25, %28 : vector<16x16x4xf32>
    %30 = arith.addf %24, %29 : vector<16x16x4xf32>
    %c1_21 = arith.constant 1 : index
    %c7_22 = arith.constant 7 : index
    %c0_23 = arith.constant 0 : index
    %31 = vector.load %arg9[%c1_21, %c7_22, %c0_23] : memref<18x32x4xf32, #tpu.memory_space<vmem>>, vector<16x16x4xf32>
    %32 = vector.extract_strided_slice %11 {offsets = [3, 0], sizes = [1, 4], strides = [1, 1]} : vector<9x4xf32> to vector<1x4xf32>
    %33 = vector.shape_cast %32 : vector<1x4xf32> to vector<1x1x4xf32>
    %34 = vector.broadcast %33 : vector<1x1x4xf32> to vector<16x16x4xf32>
    %35 = arith.mulf %31, %34 : vector<16x16x4xf32>
    %36 = arith.addf %30, %35 : vector<16x16x4xf32>
    %c1_24 = arith.constant 1 : index
    %c8_25 = arith.constant 8 : index
    %c0_26 = arith.constant 0 : index
    %37 = vector.load %arg9[%c1_24, %c8_25, %c0_26] : memref<18x32x4xf32, #tpu.memory_space<vmem>>, vector<16x16x4xf32>
    %38 = vector.extract_strided_slice %11 {offsets = [4, 0], sizes = [1, 4], strides = [1, 1]} : vector<9x4xf32> to vector<1x4xf32>
    %39 = vector.shape_cast %38 : vector<1x4xf32> to vector<1x1x4xf32>
    %40 = vector.broadcast %39 : vector<1x1x4xf32> to vector<16x16x4xf32>
    %41 = arith.mulf %37, %40 : vector<16x16x4xf32>
    %42 = arith.addf %36, %41 : vector<16x16x4xf32>
    %c1_27 = arith.constant 1 : index
    %c9_28 = arith.constant 9 : index
    %c0_29 = arith.constant 0 : index
    %43 = vector.load %arg9[%c1_27, %c9_28, %c0_29] : memref<18x32x4xf32, #tpu.memory_space<vmem>>, vector<16x16x4xf32>
    %44 = vector.extract_strided_slice %11 {offsets = [5, 0], sizes = [1, 4], strides = [1, 1]} : vector<9x4xf32> to vector<1x4xf32>
    %45 = vector.shape_cast %44 : vector<1x4xf32> to vector<1x1x4xf32>
    %46 = vector.broadcast %45 : vector<1x1x4xf32> to vector<16x16x4xf32>
    %47 = arith.mulf %43, %46 : vector<16x16x4xf32>
    %48 = arith.addf %42, %47 : vector<16x16x4xf32>
    %c2 = arith.constant 2 : index
    %c7_30 = arith.constant 7 : index
    %c0_31 = arith.constant 0 : index
    %49 = vector.load %arg9[%c2, %c7_30, %c0_31] : memref<18x32x4xf32, #tpu.memory_space<vmem>>, vector<16x16x4xf32>
    %50 = vector.extract_strided_slice %11 {offsets = [6, 0], sizes = [1, 4], strides = [1, 1]} : vector<9x4xf32> to vector<1x4xf32>
    %51 = vector.shape_cast %50 : vector<1x4xf32> to vector<1x1x4xf32>
    %52 = vector.broadcast %51 : vector<1x1x4xf32> to vector<16x16x4xf32>
    %53 = arith.mulf %49, %52 : vector<16x16x4xf32>
    %54 = arith.addf %48, %53 : vector<16x16x4xf32>
    %c2_32 = arith.constant 2 : index
    %c8_33 = arith.constant 8 : index
    %c0_34 = arith.constant 0 : index
    %55 = vector.load %arg9[%c2_32, %c8_33, %c0_34] : memref<18x32x4xf32, #tpu.memory_space<vmem>>, vector<16x16x4xf32>
    %56 = vector.extract_strided_slice %11 {offsets = [7, 0], sizes = [1, 4], strides = [1, 1]} : vector<9x4xf32> to vector<1x4xf32>
    %57 = vector.shape_cast %56 : vector<1x4xf32> to vector<1x1x4xf32>
    %58 = vector.broadcast %57 : vector<1x1x4xf32> to vector<16x16x4xf32>
    %59 = arith.mulf %55, %58 : vector<16x16x4xf32>
    %60 = arith.addf %54, %59 : vector<16x16x4xf32>
    %c2_35 = arith.constant 2 : index
    %c9_36 = arith.constant 9 : index
    %c0_37 = arith.constant 0 : index
    %61 = vector.load %arg9[%c2_35, %c9_36, %c0_37] : memref<18x32x4xf32, #tpu.memory_space<vmem>>, vector<16x16x4xf32>
    %62 = vector.extract_strided_slice %11 {offsets = [8, 0], sizes = [1, 4], strides = [1, 1]} : vector<9x4xf32> to vector<1x4xf32>
    %63 = vector.shape_cast %62 : vector<1x4xf32> to vector<1x1x4xf32>
    %64 = vector.broadcast %63 : vector<1x1x4xf32> to vector<16x16x4xf32>
    %65 = arith.mulf %61, %64 : vector<16x16x4xf32>
    %66 = arith.addf %60, %65 : vector<16x16x4xf32>
    %c0_38 = arith.constant 0 : index
    %c0_39 = arith.constant 0 : index
    %67 = vector.load %arg5[%c0_38, %c0_39] : memref<1x4xf32, #tpu.memory_space<vmem>>, vector<1x4xf32>
    %68 = vector.shape_cast %67 : vector<1x4xf32> to vector<1x1x4xf32>
    %69 = vector.broadcast %68 : vector<1x1x4xf32> to vector<16x16x4xf32>
    %70 = arith.addf %66, %69 : vector<16x16x4xf32>
    %71 = vector.shape_cast %70 : vector<16x16x4xf32> to vector<256x4xf32>
    %c0_40 = arith.constant 0 : index
    %c0_41 = arith.constant 0 : index
    %72 = vector.load %arg6[%c0_40, %c0_41] : memref<4x8xf32, #tpu.memory_space<vmem>>, vector<4x8xf32>
    %cst_42 = arith.constant dense<0.000000e+00> : vector<256x8xf32>
    %73 = tpu.matmul %6, %72, %cst_42 {dimension_numbers = #tpu.dot_dimension_numbers<[1], [0], [0], [1], [0, 0, 1, 1], [], []>} : vector<256x4xf32>, vector<4x8xf32>, vector<256x8xf32> -> vector<256x8xf32>
    %c0_43 = arith.constant 0 : index
    %c0_44 = arith.constant 0 : index
    %74 = vector.load %arg7[%c0_43, %c0_44] : memref<4x8xf32, #tpu.memory_space<vmem>>, vector<4x8xf32>
    %cst_45 = arith.constant dense<0.000000e+00> : vector<256x8xf32>
    %75 = tpu.matmul %71, %74, %cst_45 {dimension_numbers = #tpu.dot_dimension_numbers<[1], [0], [0], [1], [0, 0, 1, 1], [], []>} : vector<256x4xf32>, vector<4x8xf32>, vector<256x8xf32> -> vector<256x8xf32>
    %76 = arith.addf %73, %75 : vector<256x8xf32>
    %c0_46 = arith.constant 0 : index
    %c0_47 = arith.constant 0 : index
    %c0_48 = arith.constant 0 : index
    %77 = vector.load %arg8[%c0_46, %c0_47, %c0_48] : memref<1x256x8xf32, #tpu.memory_space<vmem>>, vector<1x256x8xf32>
    %78 = vector.shape_cast %77 : vector<1x256x8xf32> to vector<256x8xf32>
    %79 = vector.shape_cast %76 : vector<256x8xf32> to vector<1x256x8xf32>
    tpu.vector_store %arg8[%c0_46, %c0_47, %c0_48], %79 {strides = array<i32>} : memref<1x256x8xf32, #tpu.memory_space<vmem>>, vector<1x256x8xf32>,
    return
  }
  func.func @transform_0(%arg0: i32) -> (i32, i32, i32) {
    %c0_i32 = arith.constant 0 : i32
    %c0_i32_0 = arith.constant 0 : i32
    %c0_i32_1 = arith.constant 0 : i32
    return %arg0, %c0_i32, %c0_i32_0 : i32, i32, i32
  }
  func.func @transform_1(%arg0: i32) -> (i32, i32) {
    %c0_i32 = arith.constant 0 : i32
    %c0_i32_0 = arith.constant 0 : i32
    %c0_i32_1 = arith.constant 0 : i32
    return %c0_i32, %c0_i32_0 : i32, i32
  }
  func.func @transform_2(%arg0: i32) -> (i32, i32) {
    %c0_i32 = arith.constant 0 : i32
    %c0_i32_0 = arith.constant 0 : i32
    %c0_i32_1 = arith.constant 0 : i32
    return %c0_i32, %c0_i32_0 : i32, i32
  }
  func.func @transform_3(%arg0: i32) -> (i32, i32) {
    %c0_i32 = arith.constant 0 : i32
    %c0_i32_0 = arith.constant 0 : i32
    %c0_i32_1 = arith.constant 0 : i32
    return %c0_i32, %c0_i32_0 : i32, i32
  }
  func.func @transform_4(%arg0: i32) -> (i32, i32) {
    %c0_i32 = arith.constant 0 : i32
    %c0_i32_0 = arith.constant 0 : i32
    %c0_i32_1 = arith.constant 0 : i32
    return %c0_i32, %c0_i32_0 : i32, i32
  }
  func.func @transform_5(%arg0: i32) -> (i32, i32) {
    %c0_i32 = arith.constant 0 : i32
    %c0_i32_0 = arith.constant 0 : i32
    %c0_i32_1 = arith.constant 0 : i32
    return %c0_i32, %c0_i32_0 : i32, i32
  }
  func.func @transform_6(%arg0: i32) -> (i32, i32) {
    %c0_i32 = arith.constant 0 : i32
    %c0_i32_0 = arith.constant 0 : i32
    %c0_i32_1 = arith.constant 0 : i32
    return %c0_i32, %c0_i32_0 : i32, i32
  }
  func.func @transform_7(%arg0: i32) -> (i32, i32, i32) {
    %c0_i32 = arith.constant 0 : i32
    %c0_i32_0 = arith.constant 0 : i32
    %c0_i32_1 = arith.constant 0 : i32
    return %arg0, %c0_i32, %c0_i32_0 : i32, i32, i32
  }
}

</mosaic_0001>

<bundles_post_ra>
// kernel: tpu_custom_call.1
= control target key start
LH: loop header
LB: loop body
LE: loop exit
PB: predicated region body
PF: predicated region fallthrough
CT: control target
= control target key end

     0   :  { %s2889_s24 = smov 0   ;;  %s3974_s0 = inlined_call_operand.vmem [shape: f32[2,256,4], index: 0, kind: input, shape index: {}]   ;;  %s3975_s1 = inlined_call_operand.vmem [shape: f32[4,4], index: 1, kind: input, shape index: {}]   ;;  %s3976_s2 = inlined_call_operand.vmem [shape: f32[1,4], index: 2, kind: input, shape index: {}]   ;;  %s3977_s3 = inlined_call_operand.vmem [shape: f32[9,4], index: 3, kind: input, shape index: {}]   ;;  %s3978_s4 = inlined_call_operand.vmem [shape: f32[1,4], index: 4, kind: input, shape index: {}]   ;;  %s3979_s5 = inlined_call_operand.vmem [shape: f32[4,8], index: 5, kind: input, shape index: {}]   ;;  %s3980_s6 = inlined_call_operand.vmem [shape: f32[4,8], index: 6, kind: input, shape index: {}]   ;;  %s3981_s7 = inlined_call_operand.vmem [shape: f32[2,256,8], index: 7, kind: output, shape index: {}]  }
   0x1 LB: > { %s2430_s25 = sadd.s32 4294967295, %s2846_s24   ;;  %p2434_p0 = scmp.ge.s32.totalorder %s2846_s24, 1  ;;  %s2846_s24 = sphi %s2889_s24, %s17_s24  }
   0x2   : > { %p237_p1 = scmp.lt.s32.totalorder %s2846_s24, 3 }
   0x4   : > { %p238_p2 = pnand %p2434_p0, %p237_p1 }
   0x6   : > { %241 = sbr.rel (%p238_p2) target bundleno = 682 (0x2aa), region = 48 }
   0xd   : > { %v311_v0 = vld [vmem:[%s3975_s1] sm:$0xf]  ;;  %vm416_vm0 = vcmask 1043456   ;;  %p269_p3 = scmp.lt.s32.totalorder %s2430_s25, 1  ;;  %vm319_vm1 = vcmask 31744   ;;  %v2848_v33 = vmov 0.0   ;;  %v784_v36 = vlaneseq }
   0xe   : > { %2644 = vmatprep.subr.msk.mxu0 %vm416_vm0, %v311_v0  ;;  %651 = vst.msk [vmem:[#allocation2 + $0x30] sm:$0xff] %vm319_vm1, %v2848_v33  ;;  %645 = vst.msk [vmem:[#allocation2] sm:$0xff] %vm319_vm1, %v2848_v33  ;;  %v1693_v34 = vld [vmem:[%s3980_s6] sm:$0xf]  ;;  %vm2342_vm2 = vcmask 64512  }
   0xf   : > { %2645 = vmatpush3.msk.msra.mxu0 %vm416_vm0, %v311_v0  ;;  %s4010_s25 = smov (!%p269_p3, %s2430_s25), 1  ;;  %646 = vst.msk [vmem:[#allocation2 + $0x8] sm:$0xff] %vm319_vm1, %v2848_v33  ;;  %647 = vst.msk [vmem:[#allocation2 + $0x10] sm:$0xff] %vm319_vm1, %v2848_v33  ;;  %2794 = vmatprep.subr.msk.mxu1 %vm416_vm0, %v1693_v34  ;;  %v1692_v35 = vld [vmem:[%s3979_s5] sm:$0xf]  ;;  %v785_v37 = vshrl.u32 %v784_v36, 7 }
  0x10   : > { %s2543_s28 = sshll.u32 %s4010_s25, 8  ;;  %648 = vst.msk [vmem:[#allocation2 + $0x18] sm:$0xff] %vm319_vm1, %v2848_v33  ;;  %649 = vst.msk [vmem:[#allocation2 + $0x20] sm:$0xff] %vm319_vm1, %v2848_v33  ;;  %2694 = vmatprep.subr.msk.mxu0 %vm416_vm0, %v1693_v34  ;;  %2795 = vmatpush3.msk.msra.mxu1 %vm416_vm0, %v1693_v34  ;;  %v750_v40 = vld [vmem:[%s3977_s3] sm:$0xff]  ;;  %v3206_v36 = vld [vmem:[%s3977_s3 + $0x8] ss:$0 sm:$0xff] }
  0x11   : > { %s2910_s8 = scalar_lea.vmem %s3974_s0, %s2543_s28  ;;  %650 = vst.msk [vmem:[#allocation2 + $0x28] sm:$0xff] %vm319_vm1, %v2848_v33  ;;  %652 = vst.msk [vmem:[#allocation2 + $0x38] sm:$0xff] %vm319_vm1, %v2848_v33  ;;  %2744 = vmatprep.subr.msk.mxu1 %vm416_vm0, %v1692_v35  ;;  %v786_v38 = vsub.s32 0, %v785_v37  ;;  %v886_v39 = vsub.s32 1, %v785_v37  ;;  %v3137_v41 = vld [vmem:[%s3976_s2] ss:$0 sm:$0xff]  ;;  %s3905_s9 = scalar_lea.vmem %s3981_s7, %s2543_s28 }
  0x12   : > { %v279_v1 = vld [vmem:[%s2910_s8] sm:$0xff]  ;;  %v280_v2 = vld [vmem:[%s2910_s8 + $0x8] sm:$0xff]  ;;  %v281_v3 = vld [vmem:[%s2910_s8 + $0x10] sm:$0xff]  ;;  %653 = vst.msk [vmem:[#allocation2 + $0x40] sm:$0xff] %vm319_vm1, %v2848_v33  ;;  %v986_v44 = vsub.s32 2, %v785_v37  ;;  %v1086_v60 = vsub.s32 3, %v785_v37 }
  0x13   : > { %2646 = vmatprep.mubr.msk.f32.mxu0 %vm319_vm1, %v279_v1  ;;  %v282_v4 = vld [vmem:[%s2910_s8 + $0x18] sm:$0xff]  ;;  %v283_v5 = vld [vmem:[%s2910_s8 + $0x20] sm:$0xff]  ;;  %v284_v6 = vld [vmem:[%s2910_s8 + $0x28] sm:$0xff]  ;;  %654 = vst.msk [vmem:[#allocation2 + $0x48] sm:$0xff] %vm319_vm1, %v2848_v33  ;;  %v3139_v42 = vrot.slane %v750_v40, %v786_v38  ;;  %v3141_v43 = vrot.slane %v750_v40, %v886_v39  ;;  %v1186_v61 = vsub.s32 4, %v785_v37  ;;  %v1286_v1 = vsub.s32 5, %v785_v37 }
  0x14   : > { %2647 = vmatmul.mubr.msk.f32.vlgmr.msra.gmra.mrb[0].mxu0 %vm319_vm1, %v280_v2  ;;  %v285_v7 = vld [vmem:[%s2910_s8 + $0x30] sm:$0xff]  ;;  %v286_v8 = vld [vmem:[%s2910_s8 + $0x38] sm:$0xff]  ;;  %v287_v9 = vld [vmem:[%s2910_s8 + $0x40] sm:$0xff]  ;;  %655 = vst.msk [vmem:[#allocation2 + $0x50] sm:$0xff] %vm319_vm1, %v2848_v33  ;;  %v3151_v55 = vrot.slane %v750_v40, %v986_v44 }
  0x15   : > { %2649 = vmatprep.mubr.msk.f32.mxu0 %vm319_vm1, %v281_v3  ;;  %v288_v10 = vld [vmem:[%s2910_s8 + $0x48] sm:$0xff]  ;;  %v289_v11 = vld [vmem:[%s2910_s8 + $0x50] sm:$0xff]  ;;  %v290_v12 = vld [vmem:[%s2910_s8 + $0x58] sm:$0xff]  ;;  %656 = vst.msk [vmem:[#allocation2 + $0x58] sm:$0xff] %vm319_vm1, %v2848_v33  ;;  %2695 = vmatpush3.msk.msra.mxu0 %vm416_vm0, %v1693_v34 }
  0x16   : > { %v291_v13 = vld [vmem:[%s2910_s8 + $0x60] sm:$0xff]  ;;  %v292_v14 = vld [vmem:[%s2910_s8 + $0x68] sm:$0xff]  ;;  %v293_v15 = vld [vmem:[%s2910_s8 + $0x70] sm:$0xff]  ;;  %657 = vst.msk [vmem:[#allocation2 + $0x60] sm:$0xff] %vm319_vm1, %v2848_v33 }
  0x17   : > { %v294_v16 = vld [vmem:[%s2910_s8 + $0x78] sm:$0xff]  ;;  %v295_v17 = vld [vmem:[%s2910_s8 + $0x80] sm:$0xff]  ;;  %v296_v18 = vld [vmem:[%s2910_s8 + $0x88] sm:$0xff]  ;;  %658 = vst.msk [vmem:[#allocation2 + $0x68] sm:$0xff] %vm319_vm1, %v2848_v33 }
  0x18   : > { %2650 = vmatmul.mubr.msk.f32.gmra.mrb[2].mxu0 %vm319_vm1, %v282_v4  ;;  %v297_v19 = vld [vmem:[%s2910_s8 + $0x90] sm:$0xff]  ;;  %v298_v20 = vld [vmem:[%s2910_s8 + $0x98] sm:$0xff]  ;;  %v299_v21 = vld [vmem:[%s2910_s8 + $0xa0] sm:$0xff]  ;;  %659 = vst.msk [vmem:[#allocation2 + $0x70] sm:$0xff] %vm319_vm1, %v2848_v33 }
  0x19   : > { %2652 = vmatprep.mubr.msk.f32.mxu0 %vm319_vm1, %v283_v5  ;;  %v300_v22 = vld [vmem:[%s2910_s8 + $0xa8] sm:$0xff]  ;;  %v301_v23 = vld [vmem:[%s2910_s8 + $0xb0] sm:$0xff]  ;;  %v302_v24 = vld [vmem:[%s2910_s8 + $0xb8] sm:$0xff]  ;;  %660 = vst.msk [vmem:[#allocation2 + $0x78] sm:$0xff] %vm319_vm1, %v2848_v33  ;;  %v1487_v5 = vsub.s32 7, %v785_v37 }
  0x1a   : > { %v303_v25 = vld [vmem:[%s2910_s8 + $0xc0] sm:$0xff]  ;;  %v304_v26 = vld [vmem:[%s2910_s8 + $0xc8] sm:$0xff]  ;;  %v305_v27 = vld [vmem:[%s2910_s8 + $0xd0] sm:$0xff]  ;;  %661 = vst.msk [vmem:[#allocation2 + $0x80] sm:$0xff] %vm319_vm1, %v2848_v33 }
  0x1b   : > { %v306_v28 = vld [vmem:[%s2910_s8 + $0xd8] sm:$0xff]  ;;  %v307_v29 = vld [vmem:[%s2910_s8 + $0xe0] sm:$0xff]  ;;  %v308_v30 = vld [vmem:[%s2910_s8 + $0xe8] sm:$0xff]  ;;  %662 = vst.msk [vmem:[#allocation2 + $0x88] sm:$0xff] %vm319_vm1, %v2848_v33 }
  0x1c   : > { %2653 = vmatmul.mubr.msk.f32.gmra.mrb[4].mxu0 %vm319_vm1, %v284_v6  ;;  %v309_v31 = vld [vmem:[%s2910_s8 + $0xf0] sm:$0xff]  ;;  %v310_v32 = vld [vmem:[%s2910_s8 + $0xf8] sm:$0xff]  ;;  %663 = vst.msk [vmem:[#allocation2 + $0x90] sm:$0xff] %vm319_vm1, %v2848_v33  ;;  %664 = vst.msk [vmem:[#allocation2 + $0x98] sm:$0xff] %vm319_vm1, %v2848_v33 }
  0x1d   : > { %2655 = vmatprep.mubr.msk.f32.mxu0 %vm319_vm1, %v285_v7  ;;  %665 = vst.msk [vmem:[#allocation2 + $0xa0] sm:$0xff] %vm319_vm1, %v2848_v33  ;;  %666 = vst.msk [vmem:[#allocation2 + $0xa8] sm:$0xff] %vm319_vm1, %v2848_v33  ;;  %v752_v45 = vld [vmem:[#allocation2 + $0x7] sm:$0xff]  ;;  %v753_v48 = vld [vmem:[#allocation2 + $0xf] sm:$0xff] }
  0x1e   : > { %667 = vst.msk [vmem:[#allocation2 + $0xb0] sm:$0xff] %vm319_vm1, %v2848_v33  ;;  %668 = vst.msk [vmem:[#allocation2 + $0xb8] sm:$0xff] %vm319_vm1, %v2848_v33  ;;  %v852_v46 = vld [vmem:[#allocation2 + $0x8] sm:$0xff]  ;;  %v853_v49 = vld [vmem:[#allocation2 + $0x10] sm:$0xff]  ;;  %v788_v53 = vmul.f32 %v3139_v42, %v752_v45  ;;  %v789_v57 = vmul.f32 %v3139_v42, %v753_v48 }
  0x1f   : > { %669 = vst.msk [vmem:[#allocation2 + $0xc0] sm:$0xff] %vm319_vm1, %v2848_v33  ;;  %670 = vst.msk [vmem:[#allocation2 + $0xc8] sm:$0xff] %vm319_vm1, %v2848_v33  ;;  %v888_v54 = vmul.f32 %v3141_v43, %v852_v46  ;;  %v952_v56 = vld [vmem:[#allocation2 + $0x9] sm:$0xff]  ;;  %v889_v58 = vmul.f32 %v3141_v43, %v853_v49  ;;  %v953_v62 = vld [vmem:[#allocation2 + $0x11] sm:$0xff] }
  0x20   : > { %2656 = vmatmul.mubr.msk.f32.gmra.mrb[6].mxu0 %vm319_vm1, %v286_v8  ;;  %671 = vst.msk [vmem:[#allocation2 + $0xd0] sm:$0xff] %vm319_vm1, %v2848_v33  ;;  %672 = vst.msk [vmem:[#allocation2 + $0xd8] sm:$0xff] %vm319_vm1, %v2848_v33  ;;  %v988_v4 = vmul.f32 %v3151_v55, %v952_v56  ;;  %v989_v7 = vmul.f32 %v3151_v55, %v953_v62 }
  0x21   : > { %2658 = vmatprep.mubr.msk.f32.mxu0 %vm319_vm1, %v287_v9  ;;  %673 = vst.msk [vmem:[#allocation2 + $0xe0] sm:$0xff] %vm319_vm1, %v2848_v33  ;;  %674 = vst.msk [vmem:[#allocation2 + $0xe8] sm:$0xff] %vm319_vm1, %v2848_v33  ;;  %v920_v3 = vadd.f32 %v888_v54, %v788_v53  ;;  %v921_v6 = vadd.f32 %v889_v58, %v789_v57  ;;  %v3171_v9 = vrot.slane %v750_v40, %v1086_v60 }
  0x22   : > { %675 = vst.msk [vmem:[#allocation2 + $0xf0] sm:$0xff] %vm319_vm1, %v2848_v33  ;;  %676 = vst.msk [vmem:[#allocation2 + $0xf8] sm:$0xff] %vm319_vm1, %v2848_v33 }
  0x23   : > { %677 = vst.msk [vmem:[#allocation2 + $0x100] sm:$0xff] %vm319_vm1, %v2848_v33  ;;  %678 = vst.msk [vmem:[#allocation2 + $0x108] sm:$0xff] %vm319_vm1, %v2848_v33 }
  0x24   : > { %2659 = vmatmul.mubr.msk.f32.gmra.mrb[8].mxu0 %vm319_vm1, %v288_v10  ;;  %679 = vst.msk [vmem:[#allocation2 + $0x110] sm:$0xff] %vm319_vm1, %v2848_v33  ;;  %680 = vst.msk [vmem:[#allocation2 + $0x118] sm:$0xff] %vm319_vm1, %v2848_v33  ;;  %v3173_v10 = vrot.slane %v750_v40, %v1186_v61 }
  0x25   : > { %2661 = vmatprep.mubr.msk.f32.mxu0 %vm319_vm1, %v289_v11  ;;  %681 = vst.msk [vmem:[#allocation2 + $0x120] sm:$0xff] %vm319_vm1, %v2848_v33  ;;  %682 = vst.msk [vmem:[#allocation2 + $0x128] sm:$0xff] %vm319_vm1, %v2848_v33  ;;  %v1387_v11 = vsub.s32 6, %v785_v37 }
  0x26   : > { %683 = vst.msk [vmem:[#allocation2 + $0x130] sm:$0xff] %vm319_vm1, %v2848_v33  ;;  %684 = vst.msk [vmem:[#allocation2 + $0x138] sm:$0xff] %vm319_vm1, %v2848_v33 }
  0x27   : > { %685 = vst.msk [vmem:[#allocation2 + $0x140] sm:$0xff] %vm319_vm1, %v2848_v33  ;;  %686 = vst.msk [vmem:[#allocation2 + $0x148] sm:$0xff] %vm319_vm1, %v2848_v33 }
  0x28   : > { %2662 = vmatmul.mubr.msk.f32.gmra.mrb[10].mxu0 %vm319_vm1, %v290_v12  ;;  %687 = vst.msk [vmem:[#allocation2 + $0x150] sm:$0xff] %vm319_vm1, %v2848_v33  ;;  %688 = vst.msk [vmem:[#allocation2 + $0x158] sm:$0xff] %vm319_vm1, %v2848_v33 }
  0x29   : > { %2664 = vmatprep.mubr.msk.f32.mxu0 %vm319_vm1, %v291_v13  ;;  %689 = vst.msk [vmem:[#allocation2 + $0x160] sm:$0xff] %vm319_vm1, %v2848_v33  ;;  %690 = vst.msk [vmem:[#allocation2 + $0x168] sm:$0xff] %vm319_vm1, %v2848_v33 }
  0x2a   : > { %691 = vst.msk [vmem:[#allocation2 + $0x170] sm:$0xff] %vm319_vm1, %v2848_v33  ;;  %692 = vst.msk [vmem:[#allocation2 + $0x178] sm:$0xff] %vm319_vm1, %v2848_v33 }
  0x2b   : > { %693 = vst.msk [vmem:[#allocation2 + $0x180] sm:$0xff] %vm319_vm1, %v2848_v33  ;;  %694 = vst.msk [vmem:[#allocation2 + $0x188] sm:$0xff] %vm319_vm1, %v2848_v33 }
  0x2c   : > { %2665 = vmatmul.mubr.msk.f32.gmra.mrb[12].mxu0 %vm319_vm1, %v292_v14  ;;  %695 = vst.msk [vmem:[#allocation2 + $0x190] sm:$0xff] %vm319_vm1, %v2848_v33  ;;  %696 = vst.msk [vmem:[#allocation2 + $0x198] sm:$0xff] %vm319_vm1, %v2848_v33  ;;  %v3178_v14 = vrot.slane %v750_v40, %v1286_v1 }
  0x2d   : > { %2667 = vmatprep.mubr.msk.f32.mxu0 %vm319_vm1, %v293_v15  ;;  %697 = vst.msk [vmem:[#allocation2 + $0x1a0] sm:$0xff] %vm319_vm1, %v2848_v33  ;;  %698 = vst.msk [vmem:[#allocation2 + $0x1a8] sm:$0xff] %vm319_vm1, %v2848_v33 }
  0x2e   : > { %699 = vst.msk [vmem:[#allocation2 + $0x1b0] sm:$0xff] %vm319_vm1, %v2848_v33  ;;  %700 = vst.msk [vmem:[#allocation2 + $0x1b8] sm:$0xff] %vm319_vm1, %v2848_v33 }
  0x2f   : > { %701 = vst.msk [vmem:[#allocation2 + $0x1c0] sm:$0xff] %vm319_vm1, %v2848_v33  ;;  %702 = vst.msk [vmem:[#allocation2 + $0x1c8] sm:$0xff] %vm319_vm1, %v2848_v33 }
  0x30   : > { %2668 = vmatmul.mubr.msk.f32.gmra.mrb[14].mxu0 %vm319_vm1, %v294_v16  ;;  %703 = vst.msk [vmem:[#allocation2 + $0x1d0] sm:$0xff] %vm319_vm1, %v2848_v33  ;;  %704 = vst.msk [vmem:[#allocation2 + $0x1d8] sm:$0xff] %vm319_vm1, %v2848_v33  ;;  %v1020_v16 = vadd.f32 %v988_v4, %v920_v3 }
  0x31   : > { %2670 = vmatprep.mubr.msk.f32.mxu0 %vm319_vm1, %v295_v17  ;;  %705 = vst.msk [vmem:[#allocation2 + $0x1e0] sm:$0xff] %vm319_vm1, %v2848_v33  ;;  %706 = vst.msk [vmem:[#allocation2 + $0x1e8] sm:$0xff] %vm319_vm1, %v2848_v33 }
  0x32   : > { %707 = vst.msk [vmem:[#allocation2 + $0x1f0] sm:$0xff] %vm319_vm1, %v2848_v33  ;;  %708 = vst.msk [vmem:[#allocation2 + $0x1f8] sm:$0xff] %vm319_vm1, %v2848_v33 }
  0x33   : > { %709 = vst.msk [vmem:[#allocation2 + $0x200] sm:$0xff] %vm319_vm1, %v2848_v33  ;;  %710 = vst.msk [vmem:[#allocation2 + $0x208] sm:$0xff] %vm319_vm1, %v2848_v33 }
  0x34   : > { %2671 = vmatmul.mubr.msk.f32.gmra.mrb[16].mxu0 %vm319_vm1, %v296_v18  ;;  %711 = vst.msk [vmem:[#allocation2 + $0x210] sm:$0xff] %vm319_vm1, %v2848_v33  ;;  %712 = vst.msk [vmem:[#allocation2 + $0x218] sm:$0xff] %vm319_vm1, %v2848_v33 }
  0x35   : > { %2673 = vmatprep.mubr.msk.f32.mxu0 %vm319_vm1, %v297_v19  ;;  %713 = vst.msk [vmem:[#allocation2 + $0x220] sm:$0xff] %vm319_vm1, %v2848_v33  ;;  %714 = vst.msk [vmem:[#allocation2 + $0x228] sm:$0xff] %vm319_vm1, %v2848_v33 }
  0x36   : > { %715 = vst.msk [vmem:[#allocation2 + $0x230] sm:$0xff] %vm319_vm1, %v2848_v33  ;;  %716 = vst.msk [vmem:[#allocation2 + $0x238] sm:$0xff] %vm319_vm1, %v2848_v33 }
  0x38   : > { %2674 = vmatmul.mubr.msk.f32.gmra.mrb[18].mxu0 %vm319_vm1, %v298_v20 }
  0x39   : > { %2676 = vmatprep.mubr.msk.f32.mxu0 %vm319_vm1, %v299_v21  ;;  %v3185_v21 = vrot.slane %v750_v40, %v1487_v5 }
  0x3c   : > { %2677 = vmatmul.mubr.msk.f32.gmra.mrb[20].mxu0 %vm319_vm1, %v300_v22  ;;  %v1021_v22 = vadd.f32 %v989_v7, %v921_v6 }
  0x3d   : > { %2679 = vmatprep.mubr.msk.f32.mxu0 %vm319_vm1, %v301_v23 }
  0x40   : > { %2680 = vmatmul.mubr.msk.f32.gmra.mrb[22].mxu0 %vm319_vm1, %v302_v24 }
  0x41   : > { %2682 = vmatprep.mubr.msk.f32.mxu0 %vm319_vm1, %v303_v25 }
  0x44   : > { %2683 = vmatmul.mubr.msk.f32.gmra.mrb[24].mxu0 %vm319_vm1, %v304_v26  ;;  %v3190_v26 = vrot.slane %v750_v40, %v1387_v11 }
  0x45   : > { %2685 = vmatprep.mubr.msk.f32.mxu0 %vm319_vm1, %v305_v27 }
  0x48   : > { %2686 = vmatmul.mubr.msk.f32.gmra.mrb[26].mxu0 %vm319_vm1, %v306_v28 }
  0x49   : > { %2688 = vmatprep.mubr.msk.f32.mxu0 %vm319_vm1, %v307_v29 }
  0x4c   : > { %2689 = vmatmul.mubr.msk.f32.gmra.mrb[28].mxu0 %vm319_vm1, %v308_v30 }
  0x4d   : > { %2691 = vmatprep.mubr.msk.f32.mxu0 %vm319_vm1, %v309_v31 }
  0x50   : > { %2692 = vmatmul.mubr.msk.f32.gmra.mrb[30].mxu0 %vm319_vm1, %v310_v32 }
  0xe7   : > { %v2648_v47 = vpop.f32.mrb[0].mxu0 }
  0xe8   : > { %v3144_v50 = vadd.f32 %v2648_v47, %v3137_v41  ;;  %v486_v51 = vpop.f32.mrb[1].mxu0 }
  0xe9   : > { %v3147_v52 = vadd.f32 %v3137_v41, %v486_v51 }
  0xea   : > { %719 = vst.msk [vmem:[#allocation2 + $0x30] sm:$0xff] %vm319_vm1, %v3144_v50 }
  0xeb   : > { %718 = vst.msk [vmem:[#allocation2 + $0x28] sm:$0xff] %vm319_vm1, %v3147_v52  ;;  %v2651_v59 = vpop.f32.mrb[2].mxu0 }
  0xec   : > { %v3160_v63 = vadd.f32 %v2651_v59, %v3137_v41  ;;  %v496_v0 = vpop.f32.mrb[3].mxu0 }
  0xed   : > { %v3163_v2 = vadd.f32 %v3137_v41, %v496_v0 }
  0xee   : > { %721 = vst.msk [vmem:[#allocation2 + $0x50] sm:$0xff] %vm319_vm1, %v3160_v63 }
  0xef   : > { %720 = vst.msk [vmem:[#allocation2 + $0x48] sm:$0xff] %vm319_vm1, %v3163_v2  ;;  %v2654_v8 = vpop.f32.mrb[4].mxu0 }
  0xf0   : > { %v3176_v12 = vadd.f32 %v2654_v8, %v3137_v41  ;;  %v506_v13 = vpop.f32.mrb[5].mxu0 }
  0xf1   : > { %v3181_v15 = vadd.f32 %v3137_v41, %v506_v13  ;;  %v1153_v17 = vld [vmem:[#allocation2 + $0x30] sm:$0xff] }
  0xf2   : > { %v1253_v18 = vld [vmem:[#allocation2 + $0x31] sm:$0xff]  ;;  %723 = vst.msk [vmem:[#allocation2 + $0x70] sm:$0xff] %vm319_vm1, %v3176_v12  ;;  %v1052_v19 = vld [vmem:[#allocation2 + $0x27] sm:$0xff]  ;;  %v1189_v28 = vmul.f32 %v3173_v10, %v1153_v17  ;;  %v891_v44 = vmul.f32 %v1153_v17, %v3141_v43 }
  0xf3   : > { %v1152_v20 = vld [vmem:[#allocation2 + $0x28] sm:$0xff]  ;;  %722 = vst.msk [vmem:[#allocation2 + $0x68] sm:$0xff] %vm319_vm1, %v3181_v15  ;;  %v2657_v23 = vpop.f32.mrb[6].mxu0  ;;  %v1088_v24 = vmul.f32 %v3171_v9, %v1052_v19  ;;  %v790_v29 = vmul.f32 %v1052_v19, %v3139_v42  ;;  %v1289_v33 = vmul.f32 %v3178_v14, %v1253_v18  ;;  %v991_v58 = vmul.f32 %v1253_v18, %v3151_v55 }
  0xf4   : > { %v1252_v25 = vld [vmem:[#allocation2 + $0x29] sm:$0xff]  ;;  %v3195_v30 = vadd.f32 %v2657_v23, %v3137_v41  ;;  %v516_v31 = vpop.f32.mrb[7].mxu0  ;;  %v890_v34 = vmul.f32 %v1152_v20, %v3141_v43  ;;  %v1188_v38 = vmul.f32 %v3173_v10, %v1152_v20 }
  0xf5   : > { %v1053_v27 = vld [vmem:[#allocation2 + $0x2f] sm:$0xff]  ;;  %v3201_v35 = vadd.f32 %v3137_v41, %v516_v31  ;;  %v1120_v37 = vadd.f32 %v1088_v24, %v1020_v16  ;;  %v990_v48 = vmul.f32 %v1252_v25, %v3151_v55  ;;  %v1288_v54 = vmul.f32 %v3178_v14, %v1252_v25 }
  0xf6   : > { %v1089_v32 = vmul.f32 %v3171_v9, %v1053_v27  ;;  %v3209_v39 = vld [vmem:[#allocation2 + $0x50] sm:$0xff]  ;;  %725 = vst.msk [vmem:[#allocation2 + $0x90] sm:$0xff] %vm319_vm1, %v3195_v30  ;;  %v3216_v45 = vld [vmem:[#allocation2 + $0x47] sm:$0xff]  ;;  %v922_v47 = vadd.f32 %v890_v34, %v790_v29  ;;  %v791_v49 = vmul.f32 %v1053_v27, %v3139_v42 }
  0xf7   : > { %v3211_v40 = vld [vmem:[#allocation2 + $0x51] sm:$0xff]  ;;  %724 = vst.msk [vmem:[#allocation2 + $0x88] sm:$0xff] %vm319_vm1, %v3201_v35  ;;  %v2660_v51 = vpop.f32.mrb[8].mxu0  ;;  %v1220_v53 = vadd.f32 %v1188_v38, %v1120_v37  ;;  %v1490_v57 = vmul.f32 %v3185_v21, %v3209_v39  ;;  %v1453_v61 = vld [vmem:[#allocation2 + $0x48] sm:$0xff]  ;;  %v1389_v5 = vmul.f32 %v3190_v26, %v3216_v45  ;;  %v1090_v7 = vmul.f32 %v3216_v45, %v3171_v9  ;;  %v3267_v38 = vld [vmem:[%s3978_s4] ss:$0 sm:$0xff] }
  0xf8   : > { %v1121_v46 = vadd.f32 %v1089_v32, %v1021_v22  ;;  %v3223_v56 = vld [vmem:[#allocation2 + $0x4f] sm:$0xff]  ;;  %v3229_v59 = vadd.f32 %v2660_v51, %v3137_v41  ;;  %v526_v60 = vpop.f32.mrb[9].mxu0  ;;  %v1590_v0 = vmul.f32 %v3206_v36, %v3211_v40  ;;  %v1022_v1 = vadd.f32 %v990_v48, %v922_v47 }
  0xf9   : > { %v3234_v3 = vadd.f32 %v3137_v41, %v526_v60  ;;  %v1320_v4 = vadd.f32 %v1288_v54, %v1220_v53  ;;  %v1553_v6 = vld [vmem:[#allocation2 + $0x49] sm:$0xff]  ;;  %v1390_v11 = vmul.f32 %v3190_v26, %v3223_v56  ;;  %v923_v13 = vadd.f32 %v891_v44, %v791_v49 }
  0xfa   : > { %v1221_v62 = vadd.f32 %v1189_v28, %v1121_v46  ;;  %727 = vst.msk [vmem:[#allocation2 + $0xb0] sm:$0xff] %vm319_vm1, %v3229_v59  ;;  %v1091_v16 = vmul.f32 %v3223_v56, %v3171_v9  ;;  %v1489_v19 = vmul.f32 %v3185_v21, %v1453_v61  ;;  %v1122_v20 = vadd.f32 %v1090_v7, %v1022_v1  ;;  %v3250_v23 = vld [vmem:[#allocation2 + $0x67] sm:$0xff]  ;;  %v3281_v60 = vld [vmem:[#allocation2 + $0x6f] sm:$0xff] }
  0xfb   : > { %726 = vst.msk [vmem:[#allocation2 + $0xa8] sm:$0xff] %vm319_vm1, %v3234_v3  ;;  %v2663_v17 = vpop.f32.mrb[10].mxu0  ;;  %v1421_v18 = vadd.f32 %v1389_v5, %v1320_v4  ;;  %v1190_v22 = vmul.f32 %v1453_v61, %v3173_v10  ;;  %v1589_v27 = vmul.f32 %v3206_v36, %v1553_v6  ;;  %v3256_v29 = vld [vmem:[#allocation2 + $0x68] sm:$0xff]  ;;  %v1023_v31 = vadd.f32 %v991_v58, %v923_v13 }
  0xfc   : > { %v1321_v8 = vadd.f32 %v1289_v33, %v1221_v62  ;;  %v3253_v24 = vadd.f32 %v2663_v17, %v3137_v41  ;;  %v536_v25 = vpop.f32.mrb[11].mxu0  ;;  %v1290_v37 = vmul.f32 %v1553_v6, %v3178_v14  ;;  %v1391_v46 = vmul.f32 %v3190_v26, %v3250_v23  ;;  %v3277_v58 = vld [vmem:[#allocation2 + $0x69] sm:$0xff] }
  0xfd   : > { %v3259_v32 = vadd.f32 %v3137_v41, %v536_v25  ;;  %v1521_v33 = vadd.f32 %v1489_v19, %v1421_v18  ;;  %v1222_v34 = vadd.f32 %v1190_v22, %v1122_v20  ;;  %v1123_v47 = vadd.f32 %v1091_v16, %v1023_v31  ;;  %v3292_v16 = vld [vmem:[#allocation2 + $0x70] sm:$0xff] }
  0xfe   : > { %v1422_v28 = vadd.f32 %v1390_v11, %v1321_v8  ;;  %729 = vst.msk [vmem:[#allocation2 + $0xd0] sm:$0xff] %vm319_vm1, %v3253_v24  ;;  %v1191_v48 = vmul.f32 %v3209_v39, %v3173_v10  ;;  %v1491_v54 = vmul.f32 %v3185_v21, %v3256_v29  ;;  %v792_v7 = vmul.f32 %v3216_v45, %v3139_v42 }
  0xff   : > { %728 = vst.msk [vmem:[#allocation2 + $0xc8] sm:$0xff] %vm319_vm1, %v3259_v32  ;;  %v2666_v49 = vpop.f32.mrb[12].mxu0  ;;  %v1621_v51 = vadd.f32 %v1589_v27, %v1521_v33  ;;  %v1322_v53 = vadd.f32 %v1290_v37, %v1222_v34  ;;  %v892_v17 = vmul.f32 %v1453_v61, %v3141_v43  ;;  %v1392_v45 = vmul.f32 %v3190_v26, %v3281_v60  ;;  %v3305_v61 = vld [vmem:[#allocation2 + $0x71] sm:$0xff] }
 0x100   : > { %v1522_v44 = vadd.f32 %v1490_v57, %v1422_v28  ;;  %v1291_v57 = vmul.f32 %v3211_v40, %v3178_v14  ;;  %v3284_v62 = vadd.f32 %v2666_v49, %v3137_v41  ;;  %v546_v1 = vpop.f32.mrb[13].mxu0  ;;  %v1223_v5 = vadd.f32 %v1191_v48, %v1123_v47 }
 0x101   : > { %v3289_v8 = vadd.f32 %v3137_v41, %v546_v1  ;;  %v1660_v11 = vadd.f32 %v3267_v38, %v1621_v51  ;;  %v1423_v13 = vadd.f32 %v1391_v46, %v1322_v53  ;;  %v924_v25 = vadd.f32 %v892_v17, %v792_v7 }
 0x102   : > { %v1622_v4 = vadd.f32 %v1590_v0, %v1522_v44  ;;  %731 = vst.msk [vmem:[#allocation2 + $0xf0] sm:$0xff] %vm319_vm1, %v3284_v62  ;;  %v1591_v0 = vmul.f32 %v3206_v36, %v3277_v58  ;;  %v1323_v19 = vadd.f32 %v1291_v57, %v1223_v5  ;;  %v992_v27 = vmul.f32 %v1553_v6, %v3151_v55 }
 0x103   : > { %730 = vst.msk [vmem:[#allocation2 + $0xe8] sm:$0xff] %vm319_vm1, %v3289_v8  ;;  %v2669_v20 = vpop.f32.mrb[14].mxu0  ;;  %2696 = vmatprep.mubr.msk.f32.mxu0 %vm319_vm1, %v1660_v11  ;;  %v1523_v22 = vadd.f32 %v1491_v54, %v1423_v13  ;;  %v1092_v28 = vmul.f32 %v3250_v23, %v3171_v9  ;;  %v1492_v37 = vmul.f32 %v3185_v21, %v3292_v16  ;;  %v3339_v11 = vld [vmem:[#allocation2 + $0x88] sm:$0xff] }
 0x104   : > { %v1661_v18 = vadd.f32 %v3267_v38, %v1622_v4  ;;  %v3311_v31 = vadd.f32 %v2669_v20, %v3137_v41  ;;  %v556_v33 = vpop.f32.mrb[15].mxu0  ;;  %v1424_v34 = vadd.f32 %v1392_v45, %v1323_v19  ;;  %v1024_v47 = vadd.f32 %v992_v27, %v924_v25  ;;  %v3332_v4 = vld [vmem:[#allocation2 + $0x87] sm:$0xff] }
 0x105   : > { %v3317_v44 = vadd.f32 %v3137_v41, %v556_v33  ;;  %v1623_v46 = vadd.f32 %v1591_v0, %v1523_v22  ;;  %v1592_v48 = vmul.f32 %v3206_v36, %v3305_v61  ;;  %v793_v49 = vmul.f32 %v3223_v56, %v3139_v42  ;;  %v3341_v13 = vld [vmem:[#allocation2 + $0x89] sm:$0xff] }
 0x106   : > { %2697 = vmatmul.mubr.msk.f32.vlgmr.msra.gmra.mrb[32].mxu0 %vm319_vm1, %v1661_v18  ;;  %733 = vst.msk [vmem:[#allocation2 + $0x110] sm:$0xff] %vm319_vm1, %v3311_v31  ;;  %v1524_v6 = vadd.f32 %v1492_v37, %v1424_v34  ;;  %v893_v51 = vmul.f32 %v3209_v39, %v3141_v43  ;;  %v1124_v57 = vadd.f32 %v1092_v28, %v1024_v47  ;;  %v3364_v37 = vld [vmem:[#allocation2 + $0x8f] sm:$0xff] }
 0x107   : > { %732 = vst.msk [vmem:[#allocation2 + $0x108] sm:$0xff] %vm319_vm1, %v3317_v44  ;;  %v2672_v53 = vpop.f32.mrb[16].mxu0  ;;  %v1662_v54 = vadd.f32 %v3267_v38, %v1623_v46  ;;  %v1192_v1 = vmul.f32 %v3256_v29, %v3173_v10  ;;  %v993_v5 = vmul.f32 %v3211_v40, %v3151_v55  ;;  %v1093_v18 = vmul.f32 %v3281_v60, %v3171_v9 }
 0x108   : > { %v3337_v56 = vadd.f32 %v2672_v53, %v3137_v41  ;;  %v566_v7 = vpop.f32.mrb[17].mxu0  ;;  %v1624_v39 = vadd.f32 %v1592_v48, %v1524_v6  ;;  %v925_v17 = vadd.f32 %v893_v51, %v793_v49  ;;  %v1292_v40 = vmul.f32 %v3277_v58, %v3178_v14 }
 0x109   : > { %2699 = vmatprep.mubr.msk.f32.mxu0 %vm319_vm1, %v1662_v54  ;;  %v3347_v0 = vadd.f32 %v3137_v41, %v566_v7  ;;  %v1224_v19 = vadd.f32 %v1192_v1, %v1124_v57  ;;  %v1393_v20 = vmul.f32 %v3190_v26, %v3332_v4  ;;  %v794_v25 = vmul.f32 %v3250_v23, %v3139_v42 }
 0x10a   : > { %735 = vst.msk [vmem:[#allocation2 + $0x130] sm:$0xff] %vm319_vm1, %v3337_v56  ;;  %v1663_v45 = vadd.f32 %v3267_v38, %v1624_v39  ;;  %v1025_v22 = vadd.f32 %v993_v5, %v925_v17  ;;  %v1493_v33 = vmul.f32 %v3185_v21, %v3339_v11  ;;  %v1593_v34 = vmul.f32 %v3206_v36, %v3341_v13  ;;  %v1458_v39 = vld [vmem:[#allocation2 + $0x90] sm:$0xff] }
 0x10b   : > { %734 = vst.msk [vmem:[#allocation2 + $0x128] sm:$0xff] %vm319_vm1, %v3347_v0  ;;  %v2675_v27 = vpop.f32.mrb[18].mxu0  ;;  %v1324_v28 = vadd.f32 %v1292_v40, %v1224_v19  ;;  %v894_v46 = vmul.f32 %v3256_v29, %v3141_v43  ;;  %v1193_v48 = vmul.f32 %v3292_v16, %v3173_v10  ;;  %v994_v49 = vmul.f32 %v3277_v58, %v3151_v55  ;;  %v3391_v17 = vld [vmem:[#allocation2 + $0x91] sm:$0xff] }
 0x10c   : > { %2700 = vmatmul.mubr.msk.f32.gmra.mrb[34].mxu0 %vm319_vm1, %v1663_v45  ;;  %v3370_v23 = vadd.f32 %v2675_v27, %v3137_v41  ;;  %v576_v47 = vpop.f32.mrb[19].mxu0  ;;  %v1125_v6 = vadd.f32 %v1093_v18, %v1025_v22  ;;  %v1094_v29 = vmul.f32 %v3332_v4, %v3171_v9  ;;  %v1293_v1 = vmul.f32 %v3305_v61, %v3178_v14 }
 0x10d   : > { %v1425_v51 = vadd.f32 %v1393_v20, %v1324_v28  ;;  %v3377_v53 = vadd.f32 %v3137_v41, %v576_v47  ;;  %v926_v54 = vadd.f32 %v894_v46, %v794_v25  ;;  %v1394_v5 = vmul.f32 %v3190_v26, %v3364_v37 }
 0x10e   : > { %3991 = vst [vmem:[#allocation3_spill] sm:$0xff] %v3370_v23  ;;  %737 = vst.msk [vmem:[#allocation2 + $0x150] sm:$0xff] %vm319_vm1, %v3370_v23  ;;  %v1225_v57 = vadd.f32 %v1193_v48, %v1125_v6  ;;  %v795_v58 = vmul.f32 %v3281_v60, %v3139_v42  ;;  %v1194_v40 = vmul.f32 %v3339_v11, %v3173_v10  ;;  %v3400_v60 = vld [vmem:[#allocation2 + $0xa7] sm:$0xff] }
 0x10f   : > { %3992 = vst [vmem:[#allocation4_spill] sm:$0xff] %v3377_v53  ;;  %v1525_v7 = vadd.f32 %v1493_v33, %v1425_v51  ;;  %736 = vst.msk [vmem:[#allocation2 + $0x148] sm:$0xff] %vm319_vm1, %v3377_v53  ;;  %v2678_v18 = vpop.f32.mrb[20].mxu0  ;;  %v1026_v19 = vadd.f32 %v994_v49, %v926_v54  ;;  %v895_v45 = vmul.f32 %v3292_v16, %v3141_v43  ;;  %v3416_v51 = vld [vmem:[#allocation2 + $0xa8] sm:$0xff] }
 0x110   : > { %v1325_v20 = vadd.f32 %v1293_v1, %v1225_v57  ;;  %v3398_v22 = vadd.f32 %v2678_v18, %v3137_v41  ;;  %v586_v25 = vpop.f32.mrb[21].mxu0  ;;  %v995_v27 = vmul.f32 %v3305_v61, %v3151_v55  ;;  %v1095_v28 = vmul.f32 %v3364_v37, %v3171_v9  ;;  %v1563_v23 = vld [vmem:[#allocation2 + $0xe9] sm:$0xff] }
 0x111   : > { %v1625_v33 = vadd.f32 %v1593_v34, %v1525_v7  ;;  %v1126_v46 = vadd.f32 %v1094_v29, %v1026_v19  ;;  %v3407_v47 = vadd.f32 %v3137_v41, %v586_v25  ;;  %v927_v6 = vadd.f32 %v895_v45, %v795_v58  ;;  %v3423_v58 = vld [vmem:[#allocation2 + $0xa9] sm:$0xff] }
 0x112   : > { %3993 = vst [vmem:[#allocation5_spill] sm:$0xff] %v3398_v22  ;;  %v1426_v16 = vadd.f32 %v1394_v5, %v1325_v20  ;;  %v1494_v48 = vmul.f32 %v3185_v21, %v1458_v39  ;;  %v1594_v49 = vmul.f32 %v3206_v36, %v3391_v17  ;;  %739 = vst.msk [vmem:[#allocation2 + $0x170] sm:$0xff] %vm319_vm1, %v3398_v22 }
 0x113   : > { %3994 = vst [vmem:[#allocation6_spill] sm:$0xff] %v3407_v47  ;;  %v1294_v61 = vmul.f32 %v3341_v13, %v3178_v14  ;;  %v1664_v34 = vadd.f32 %v3267_v38, %v1625_v33  ;;  %v1226_v54 = vadd.f32 %v1194_v40, %v1126_v46  ;;  %v1395_v29 = vmul.f32 %v3190_v26, %v3400_v60  ;;  %v2681_v1 = vpop.f32.mrb[22].mxu0  ;;  %v3436_v33 = vld [vmem:[#allocation2 + $0xaf] sm:$0xff] }
 0x114   : > { %738 = vst.msk [vmem:[#allocation2 + $0x168] sm:$0xff] %vm319_vm1, %v3407_v47  ;;  %v1027_v57 = vadd.f32 %v995_v27, %v927_v6  ;;  %v1526_v5 = vadd.f32 %v1494_v48, %v1426_v16  ;;  %v3426_v7 = vadd.f32 %v2681_v1, %v3137_v41  ;;  %v796_v18 = vmul.f32 %v3332_v4, %v3139_v42  ;;  %v596_v40 = vpop.f32.mrb[23].mxu0  ;;  %v1463_v47 = vld [vmem:[#allocation2 + $0xe8] sm:$0xff] }
 0x115   : > { %v896_v19 = vmul.f32 %v3339_v11, %v3141_v43  ;;  %2702 = vmatprep.mubr.msk.f32.mxu0 %vm319_vm1, %v1664_v34  ;;  %v1326_v45 = vadd.f32 %v1294_v61, %v1226_v54  ;;  %v1495_v20 = vmul.f32 %v3185_v21, %v3416_v51  ;;  %v1195_v27 = vmul.f32 %v1458_v39, %v3173_v10  ;;  %v3448_v34 = vld [vmem:[#allocation2 + $0xb0] sm:$0xff] }
 0x116   : > { %3995 = vst [vmem:[#allocation7_spill] sm:$0xff] %v3426_v7  ;;  %v1127_v25 = vadd.f32 %v1095_v28, %v1027_v57  ;;  %v1626_v46 = vadd.f32 %v1594_v49, %v1526_v5  ;;  %741 = vst.msk [vmem:[#allocation2 + $0x190] sm:$0xff] %vm319_vm1, %v3426_v7  ;;  %v996_v11 = vmul.f32 %v3341_v13, %v3151_v55 }
 0x117   : > { %v928_v4 = vadd.f32 %v896_v19, %v796_v18  ;;  %v1096_v6 = vmul.f32 %v3400_v60, %v3171_v9  ;;  %v1427_v16 = vadd.f32 %v1395_v29, %v1326_v45  ;;  %v1595_v48 = vmul.f32 %v3206_v36, %v3423_v58  ;;  %v2684_v49 = vpop.f32.mrb[24].mxu0  ;;  %v3456_v19 = vld [vmem:[#allocation2 + $0xb1] sm:$0xff] }
 0x118   : > { %v1227_v28 = vadd.f32 %v1195_v27, %v1127_v25  ;;  %v1295_v61 = vmul.f32 %v3391_v17, %v3178_v14  ;;  %v1665_v54 = vadd.f32 %v3267_v38, %v1626_v46  ;;  %v1396_v57 = vmul.f32 %v3190_v26, %v3436_v33  ;;  %v606_v29 = vpop.f32.mrb[25].mxu0 }
 0x119   : > { %v1028_v13 = vadd.f32 %v996_v11, %v928_v4  ;;  %v3454_v1 = vadd.f32 %v3137_v41, %v596_v40  ;;  %v1527_v5 = vadd.f32 %v1495_v20, %v1427_v16  ;;  %v797_v45 = vmul.f32 %v3364_v37, %v3139_v42  ;;  %v3470_v37 = vld [vmem:[#allocation2 + $0xc7] sm:$0xff] }
 0x11a   : > { %v1327_v18 = vadd.f32 %v1295_v61, %v1227_v28  ;;  %v897_v25 = vmul.f32 %v1458_v39, %v3141_v43  ;;  %2703 = vmatmul.mubr.msk.f32.gmra.mrb[36].mxu0 %vm319_vm1, %v1665_v54  ;;  %v1496_v27 = vmul.f32 %v3185_v21, %v3448_v34  ;;  %v1196_v40 = vmul.f32 %v3416_v51, %v3173_v10 }
 0x11b   : > { %3996 = vst [vmem:[#allocation8_spill] sm:$0xff] %v3454_v1  ;;  %v1128_v46 = vadd.f32 %v1096_v6, %v1028_v13  ;;  %740 = vst.msk [vmem:[#allocation2 + $0x188] sm:$0xff] %vm319_vm1, %v3454_v1  ;;  %v997_v20 = vmul.f32 %v3391_v17, %v3151_v55  ;;  %v1627_v4 = vadd.f32 %v1595_v48, %v1527_v5  ;;  %v2687_v28 = vpop.f32.mrb[26].mxu0  ;;  %v1461_v13 = vld [vmem:[#allocation2 + $0xc8] sm:$0xff] }
 0x11c   : > { %v1428_v11 = vadd.f32 %v1396_v57, %v1327_v18  ;;  %v929_v39 = vadd.f32 %v897_v25, %v797_v45  ;;  %v1097_v16 = vmul.f32 %v3436_v33, %v3171_v9  ;;  %v1596_v6 = vmul.f32 %v3206_v36, %v3456_v19  ;;  %v3478_v7 = vpop.f32.mrb[27].mxu0  ;;  %v1561_v25 = vld [vmem:[#allocation2 + $0xc9] sm:$0xff] }
 0x11d   : > { %v1228_v61 = vadd.f32 %v1196_v40, %v1128_v46  ;;  %v1296_v54 = vmul.f32 %v3423_v58, %v3178_v14  ;;  %v1666_v17 = vadd.f32 %v3267_v38, %v1627_v4  ;;  %v3482_v5 = vadd.f32 %v2684_v49, %v3137_v41 }
 0x11e   : > { %v1528_v48 = vadd.f32 %v1496_v27, %v1428_v11  ;;  %v1029_v57 = vadd.f32 %v997_v20, %v929_v39  ;;  %v1397_v45 = vmul.f32 %v3190_v26, %v3470_v37  ;;  %v798_v46 = vmul.f32 %v3400_v60, %v3139_v42  ;;  %v3498_v39 = vld [vmem:[#allocation2 + $0xcf] sm:$0xff] }
 0x11f   : > { %3997 = vst [vmem:[#allocation9_spill] sm:$0xff] %v3482_v5  ;;  %v1328_v18 = vadd.f32 %v1296_v54, %v1228_v61  ;;  %v898_v40 = vmul.f32 %v3416_v51, %v3141_v43  ;;  %2705 = vmatprep.mubr.msk.f32.mxu0 %vm319_vm1, %v1666_v17  ;;  %v1497_v27 = vmul.f32 %v3185_v21, %v1461_v13  ;;  %743 = vst.msk [vmem:[#allocation2 + $0x1b0] sm:$0xff] %vm319_vm1, %v3482_v5  ;;  %v3496_v4 = vpop.f32.mrb[28].mxu0  ;;  %v3500_v60 = vld [vmem:[#allocation2 + $0xd0] sm:$0xff] }
 0x120   : > { %v1628_v1 = vadd.f32 %v1596_v6, %v1528_v48  ;;  %v1129_v20 = vadd.f32 %v1097_v16, %v1029_v57  ;;  %v1197_v49 = vmul.f32 %v3448_v34, %v3173_v10  ;;  %v998_v6 = vmul.f32 %v3423_v58, %v3151_v55  ;;  %v3506_v61 = vpop.f32.mrb[29].mxu0 }
 0x121   : > { %v1429_v11 = vadd.f32 %v1397_v45, %v1328_v18  ;;  %v930_v51 = vadd.f32 %v898_v40, %v798_v46  ;;  %v1098_v16 = vmul.f32 %v3470_v37, %v3171_v9  ;;  %v1597_v17 = vmul.f32 %v3206_v36, %v1561_v25  ;;  %v3512_v18 = vld [vmem:[#allocation2 + $0xd1] sm:$0xff] }
 0x122   : > { %v1667_v54 = vadd.f32 %v3267_v38, %v1628_v1  ;;  %v1229_v48 = vadd.f32 %v1197_v49, %v1129_v20  ;;  %v1297_v57 = vmul.f32 %v3456_v19, %v3178_v14  ;;  %v3515_v40 = vadd.f32 %v3137_v41, %v606_v29 }
 0x123   : > { %v1529_v45 = vadd.f32 %v1497_v27, %v1429_v11  ;;  %v1030_v46 = vadd.f32 %v998_v6, %v930_v51  ;;  %v799_v58 = vmul.f32 %v3436_v33, %v3139_v42  ;;  %v1398_v1 = vmul.f32 %v3190_v26, %v3498_v39  ;;  %v3526_v27 = vpop.f32.mrb[30].mxu0 }
 0x124   : > { %3998 = vst [vmem:[#allocation10_spill] sm:$0xff] %v3515_v40  ;;  %2706 = vmatmul.mubr.msk.f32.gmra.mrb[38].mxu0 %vm319_vm1, %v1667_v54  ;;  %v1329_v5 = vadd.f32 %v1297_v57, %v1229_v48  ;;  %v1498_v20 = vmul.f32 %v3185_v21, %v3500_v60  ;;  %v899_v49 = vmul.f32 %v3448_v34, %v3141_v43  ;;  %742 = vst.msk [vmem:[#allocation2 + $0x1a8] sm:$0xff] %vm319_vm1, %v3515_v40  ;;  %v3533_v6 = vpop.f32.mrb[31].mxu0  ;;  %v1363_v48 = vld [vmem:[#allocation2 + $0xe7] sm:$0xff] }
 0x125   : > { %v1629_v11 = vadd.f32 %v1597_v17, %v1529_v45  ;;  %v1598_v29 = vmul.f32 %v3206_v36, %v3512_v18  ;;  %v1130_v51 = vadd.f32 %v1098_v16, %v1030_v46  ;;  %v1198_v33 = vmul.f32 %v1461_v13, %v3173_v10 }
 0x126   : > { %v1430_v54 = vadd.f32 %v1398_v1, %v1329_v5  ;;  %v931_v57 = vadd.f32 %v899_v49, %v799_v58  ;;  %v999_v34 = vmul.f32 %v3456_v19, %v3151_v55  ;;  %v1099_v17 = vmul.f32 %v3498_v39, %v3171_v9 }
 0x127   : > { %v1668_v45 = vadd.f32 %v3267_v38, %v1629_v11  ;;  %v1230_v22 = vadd.f32 %v1198_v33, %v1130_v51  ;;  %v1298_v16 = vmul.f32 %v1561_v25, %v3178_v14  ;;  %v3542_v46 = vadd.f32 %v2687_v28, %v3137_v41  ;;  %v1364_v33 = vld [vmem:[#allocation2 + $0xef] sm:$0xff] }
 0x128   : > { %v1530_v40 = vadd.f32 %v1498_v20, %v1430_v54  ;;  %v1031_v5 = vadd.f32 %v999_v34, %v931_v57  ;;  %v800_v58 = vmul.f32 %v3470_v37, %v3139_v42  ;;  %v900_v19 = vmul.f32 %v1461_v13, %v3141_v43 }
 0x129   : > { %3999 = vst [vmem:[#allocation11_spill] sm:$0xff] %v3542_v46  ;;  %2708 = vmatprep.mubr.msk.f32.mxu0 %vm319_vm1, %v1668_v45  ;;  %v1330_v1 = vadd.f32 %v1298_v16, %v1230_v22  ;;  %v1399_v49 = vmul.f32 %v3190_v26, %v1363_v48  ;;  %v1199_v11 = vmul.f32 %v3500_v60, %v3173_v10  ;;  %745 = vst.msk [vmem:[#allocation2 + $0x1d0] sm:$0xff] %vm319_vm1, %v3542_v46  ;;  %v1464_v45 = vld [vmem:[#allocation2 + $0xf0] sm:$0xff] }
 0x12a   : > { %v1000_v28 = vmul.f32 %v1561_v25, %v3151_v55  ;;  %v1630_v20 = vadd.f32 %v1598_v29, %v1530_v40  ;;  %v1131_v51 = vadd.f32 %v1099_v17, %v1031_v5  ;;  %v932_v54 = vadd.f32 %v900_v19, %v800_v58  ;;  %v1564_v17 = vld [vmem:[#allocation2 + $0xf1] sm:$0xff] }
 0x12b   : > { %v1100_v37 = vmul.f32 %v1363_v48, %v3171_v9  ;;  %v1431_v13 = vadd.f32 %v1399_v49, %v1330_v1  ;;  %v1499_v57 = vmul.f32 %v3185_v21, %v1463_v47  ;;  %v1599_v22 = vmul.f32 %v3206_v36, %v1563_v23 }
 0x12c   : > { %v1299_v34 = vmul.f32 %v3512_v18, %v3178_v14  ;;  %v1669_v16 = vadd.f32 %v3267_v38, %v1630_v20  ;;  %v1231_v46 = vadd.f32 %v1199_v11, %v1131_v51  ;;  %v1032_v53 = vadd.f32 %v1000_v28, %v932_v54  ;;  %v1365_v28 = vld [vmem:[#allocation2 + $0x107] sm:$0xff] }
 0x12d   : > { %v3562_v25 = vadd.f32 %v3137_v41, %v3478_v7  ;;  %v1531_v40 = vadd.f32 %v1499_v57, %v1431_v13  ;;  %v1400_v29 = vmul.f32 %v3190_v26, %v1364_v33  ;;  %v801_v5 = vmul.f32 %v3498_v39, %v3139_v42 }
 0x12e   : > { %v901_v58 = vmul.f32 %v3500_v60, %v3141_v43  ;;  %2709 = vmatmul.mubr.msk.f32.gmra.mrb[40].mxu0 %vm319_vm1, %v1669_v16  ;;  %v1331_v19 = vadd.f32 %v1299_v34, %v1231_v46  ;;  %v1500_v1 = vmul.f32 %v3185_v21, %v1464_v45  ;;  %v1132_v49 = vadd.f32 %v1100_v37, %v1032_v53  ;;  %v1465_v53 = vld [vmem:[#allocation2 + $0x108] sm:$0xff] }
 0x12f   : > { %v1200_v11 = vmul.f32 %v1463_v47, %v3173_v10  ;;  %744 = vst.msk [vmem:[#allocation2 + $0x1c8] sm:$0xff] %vm319_vm1, %v3562_v25  ;;  %v1631_v7 = vadd.f32 %v1599_v22, %v1531_v40  ;;  %v1001_v39 = vmul.f32 %v3512_v18, %v3151_v55  ;;  %v1101_v51 = vmul.f32 %v1364_v33, %v3171_v9 }
 0x130   : > { %v933_v20 = vadd.f32 %v901_v58, %v801_v5  ;;  %v1432_v60 = vadd.f32 %v1400_v29, %v1331_v19  ;;  %v1600_v54 = vmul.f32 %v3206_v36, %v1564_v17  ;;  %v1300_v13 = vmul.f32 %v1563_v23, %v3178_v14  ;;  %v1565_v29 = vld [vmem:[#allocation2 + $0x109] sm:$0xff] }
 0x131   : > { %v1232_v46 = vadd.f32 %v1200_v11, %v1132_v49  ;;  %v1670_v37 = vadd.f32 %v3267_v38, %v1631_v7  ;;  %v3582_v22 = vadd.f32 %v3496_v4, %v3137_v41  ;;  %v802_v34 = vmul.f32 %v1363_v48, %v3139_v42  ;;  %v1366_v11 = vld [vmem:[#allocation2 + $0x10f] sm:$0xff] }
 0x132   : > { %v1033_v57 = vadd.f32 %v1001_v39, %v933_v20  ;;  %v1532_v16 = vadd.f32 %v1500_v1, %v1432_v60  ;;  %v1401_v40 = vmul.f32 %v3190_v26, %v1365_v28  ;;  %v902_v5 = vmul.f32 %v1463_v47, %v3141_v43  ;;  %v1466_v7 = vld [vmem:[#allocation2 + $0x110] sm:$0xff] }
 0x133   : > { %v1332_v18 = vadd.f32 %v1300_v13, %v1232_v46  ;;  %2711 = vmatprep.mubr.msk.f32.mxu0 %vm319_vm1, %v1670_v37  ;;  %v1501_v58 = vmul.f32 %v3185_v21, %v1465_v53  ;;  %v1201_v49 = vmul.f32 %v1464_v45, %v3173_v10  ;;  %747 = vst.msk [vmem:[#allocation2 + $0x1f0] sm:$0xff] %vm319_vm1, %v3582_v22 }
 0x134   : > { %v1133_v19 = vadd.f32 %v1101_v51, %v1033_v57  ;;  %v1002_v4 = vmul.f32 %v1563_v23, %v3151_v55  ;;  %v1632_v48 = vadd.f32 %v1600_v54, %v1532_v16  ;;  %v934_v20 = vadd.f32 %v902_v5, %v802_v34  ;;  %v3596_v51 = vld [vmem:[#allocation2 + $0x111] sm:$0xff] }
 0x135   : > { %v1433_v1 = vadd.f32 %v1401_v40, %v1332_v18  ;;  %v1102_v39 = vmul.f32 %v1365_v28, %v3171_v9  ;;  %v1601_v47 = vmul.f32 %v3206_v36, %v1565_v29  ;;  %v1301_v46 = vmul.f32 %v1564_v17, %v3178_v14 }
 0x136   : > { %v1233_v60 = vadd.f32 %v1201_v49, %v1133_v19  ;;  %v3600_v13 = vadd.f32 %v3137_v41, %v3506_v61  ;;  %v1671_v23 = vadd.f32 %v3267_v38, %v1632_v48  ;;  %v1034_v37 = vadd.f32 %v1002_v4, %v934_v20  ;;  %v1367_v49 = vld [vmem:[#allocation2 + $0x127] sm:$0xff] }
 0x137   : > { %v1533_v54 = vadd.f32 %v1501_v58, %v1433_v1  ;;  %v803_v57 = vmul.f32 %v1364_v33, %v3139_v42  ;;  %v1402_v16 = vmul.f32 %v3190_v26, %v1366_v11  ;;  %v1502_v18 = vmul.f32 %v3185_v21, %v1466_v7 }
 0x138   : > { %v1333_v34 = vadd.f32 %v1301_v46, %v1233_v60  ;;  %746 = vst.msk [vmem:[#allocation2 + $0x1e8] sm:$0xff] %vm319_vm1, %v3600_v13  ;;  %v903_v40 = vmul.f32 %v1464_v45, %v3141_v43  ;;  %2712 = vmatmul.mubr.msk.f32.gmra.mrb[42].mxu0 %vm319_vm1, %v1671_v23  ;;  %v1602_v5 = vmul.f32 %v3206_v36, %v3596_v51  ;;  %v1567_v23 = vld [vmem:[#allocation2 + $0x129] sm:$0xff] }
 0x139   : > { %v1633_v61 = vadd.f32 %v1601_v47, %v1533_v54  ;;  %v1134_v58 = vadd.f32 %v1102_v39, %v1034_v37  ;;  %v1202_v19 = vmul.f32 %v1465_v53, %v3173_v10  ;;  %v1003_v48 = vmul.f32 %v1564_v17, %v3151_v55  ;;  %v1467_v39 = vld [vmem:[#allocation2 + $0x128] sm:$0xff] }
 0x13a   : > { %v1434_v33 = vadd.f32 %v1402_v16, %v1333_v34  ;;  %v935_v4 = vadd.f32 %v903_v40, %v803_v57  ;;  %v1103_v1 = vmul.f32 %v1366_v11, %v3171_v9  ;;  %v1302_v45 = vmul.f32 %v1565_v29, %v3178_v14 }
 0x13b   : > { %v1672_v20 = vadd.f32 %v3267_v38, %v1633_v61  ;;  %v1234_v60 = vadd.f32 %v1202_v19, %v1134_v58  ;;  %v3619_v47 = vadd.f32 %v3526_v27, %v3137_v41  ;;  %v804_v37 = vmul.f32 %v1365_v28, %v3139_v42  ;;  %v1368_v61 = vld [vmem:[#allocation2 + $0x12f] sm:$0xff] }
 0x13c   : > { %v1534_v46 = vadd.f32 %v1502_v18, %v1434_v33  ;;  %v1035_v54 = vadd.f32 %v1003_v48, %v935_v4  ;;  %v904_v57 = vmul.f32 %v1465_v53, %v3141_v43  ;;  %v1403_v34 = vmul.f32 %v3190_v26, %v1367_v49  ;;  %v1468_v48 = vld [vmem:[#allocation2 + $0x130] sm:$0xff] }
 0x13d   : > { %2714 = vmatprep.mubr.msk.f32.mxu0 %vm319_vm1, %v1672_v20  ;;  %v1334_v17 = vadd.f32 %v1302_v45, %v1234_v60  ;;  %v1203_v16 = vmul.f32 %v1466_v7, %v3173_v10  ;;  %749 = vst.msk [vmem:[#allocation2 + $0x210] sm:$0xff] %vm319_vm1, %v3619_v47  ;;  %v1004_v27 = vmul.f32 %v1565_v29, %v3151_v55 }
 0x13e   : > { %v1634_v18 = vadd.f32 %v1602_v5, %v1534_v46  ;;  %v1135_v40 = vadd.f32 %v1103_v1, %v1035_v54  ;;  %v936_v58 = vadd.f32 %v904_v57, %v804_v37  ;;  %v1104_v28 = vmul.f32 %v1367_v49, %v3171_v9  ;;  %v1568_v46 = vld [vmem:[#allocation2 + $0x131] sm:$0xff] }
 0x13f   : > { %v1435_v19 = vadd.f32 %v1403_v34, %v1334_v17  ;;  %v1503_v53 = vmul.f32 %v3185_v21, %v1467_v39  ;;  %v1603_v33 = vmul.f32 %v3206_v36, %v1567_v23  ;;  %v1303_v4 = vmul.f32 %v3596_v51, %v3178_v14 }
 0x140   : > { %v1673_v20 = vadd.f32 %v3267_v38, %v1634_v18  ;;  %v1235_v60 = vadd.f32 %v1203_v16, %v1135_v40  ;;  %v1036_v45 = vadd.f32 %v1004_v27, %v936_v58  ;;  %v3637_v29 = vadd.f32 %v3137_v41, %v3533_v6  ;;  %v1369_v6 = vld [vmem:[#allocation2 + $0x147] sm:$0xff] }
 0x141   : > { %v1535_v5 = vadd.f32 %v1503_v53, %v1435_v19  ;;  %v1404_v1 = vmul.f32 %v3190_v26, %v1368_v61  ;;  %v805_v54 = vmul.f32 %v1366_v11, %v3139_v42  ;;  %v905_v37 = vmul.f32 %v1466_v7, %v3141_v43  ;;  %v1469_v53 = vld [vmem:[#allocation2 + $0x148] sm:$0xff] }
 0x142   : > { %2715 = vmatmul.mubr.msk.f32.gmra.mrb[44].mxu0 %vm319_vm1, %v1673_v20  ;;  %v1335_v57 = vadd.f32 %v1303_v4, %v1235_v60  ;;  %v1504_v17 = vmul.f32 %v3185_v21, %v1468_v48  ;;  %v1136_v34 = vadd.f32 %v1104_v28, %v1036_v45  ;;  %v1204_v16 = vmul.f32 %v1467_v39, %v3173_v10  ;;  %v1569_v4 = vld [vmem:[#allocation2 + $0x149] sm:$0xff] }
 0x143   : > { %748 = vst.msk [vmem:[#allocation2 + $0x208] sm:$0xff] %vm319_vm1, %v3637_v29  ;;  %v1635_v41 = vadd.f32 %v1603_v33, %v1535_v5  ;;  %v937_v27 = vadd.f32 %v905_v37, %v805_v54  ;;  %v1005_v18 = vmul.f32 %v3596_v51, %v3151_v55  ;;  %v1105_v11 = vmul.f32 %v1368_v61, %v3171_v9  ;;  %v1370_v37 = vld [vmem:[#allocation2 + $0x14f] sm:$0xff] }
 0x144   : > { %v1436_v7 = vadd.f32 %v1404_v1, %v1335_v57  ;;  %v1604_v40 = vmul.f32 %v3206_v36, %v1568_v46  ;;  %v1236_v58 = vadd.f32 %v1204_v16, %v1136_v34  ;;  %v1304_v19 = vmul.f32 %v1567_v23, %v3178_v14 }
 0x145   : > { %v1674_v28 = vadd.f32 %v3267_v38, %v1635_v41  ;;  %v1037_v20 = vadd.f32 %v1005_v18, %v937_v27  ;;  %v806_v33 = vmul.f32 %v1367_v49, %v3139_v42  ;;  %v906_v60 = vmul.f32 %v1467_v39, %v3141_v43 }
 0x146   : > { %v1536_v45 = vadd.f32 %v1504_v17, %v1436_v7  ;;  %v1336_v5 = vadd.f32 %v1304_v19, %v1236_v58  ;;  %v1405_v51 = vmul.f32 %v3190_v26, %v1369_v6  ;;  %v1205_v1 = vmul.f32 %v1468_v48, %v3173_v10  ;;  %v1470_v17 = vld [vmem:[#allocation2 + $0x150] sm:$0xff] }
 0x147   : > { %2717 = vmatprep.mubr.msk.f32.mxu0 %vm319_vm1, %v1674_v28  ;;  %v1137_v54 = vadd.f32 %v1105_v11, %v1037_v20  ;;  %v938_v57 = vadd.f32 %v906_v60, %v806_v33  ;;  %v1006_v34 = vmul.f32 %v1567_v23, %v3151_v55  ;;  %v1106_v16 = vmul.f32 %v1369_v6, %v3171_v9  ;;  %v1570_v20 = vld [vmem:[#allocation2 + $0x151] sm:$0xff] }
 0x148   : > { %v1636_v41 = vadd.f32 %v1604_v40, %v1536_v45  ;;  %v1437_v27 = vadd.f32 %v1405_v51, %v1336_v5  ;;  %v1505_v49 = vmul.f32 %v3185_v21, %v1469_v53  ;;  %v1605_v39 = vmul.f32 %v3206_v36, %v1569_v4 }
 0x149   : > { %v1237_v18 = vadd.f32 %v1205_v1, %v1137_v54  ;;  %v1305_v7 = vmul.f32 %v1568_v46, %v3178_v14  ;;  %v1038_v58 = vadd.f32 %v1006_v34, %v938_v57  ;;  %v807_v19 = vmul.f32 %v1368_v61, %v3139_v42  ;;  %v1371_v1 = vld [vmem:[#allocation2 + $0x167] sm:$0xff] }
 0x14a   : > { %v1675_v11 = vadd.f32 %v3267_v38, %v1636_v41  ;;  %v1537_v28 = vadd.f32 %v1505_v49, %v1437_v27  ;;  %v1406_v23 = vmul.f32 %v3190_v26, %v1370_v37  ;;  %v907_v40 = vmul.f32 %v1468_v48, %v3141_v43 }
 0x14b   : > { %v1337_v33 = vadd.f32 %v1305_v7, %v1237_v18  ;;  %v1506_v60 = vmul.f32 %v3185_v21, %v1470_v17  ;;  %v1138_v45 = vadd.f32 %v1106_v16, %v1038_v58  ;;  %v1206_v5 = vmul.f32 %v1469_v53, %v3173_v10  ;;  %v1471_v16 = vld [vmem:[#allocation2 + $0x168] sm:$0xff] }
 0x14c   : > { %2718 = vmatmul.mubr.msk.f32.gmra.mrb[46].mxu0 %vm319_vm1, %v1675_v11  ;;  %v1637_v51 = vadd.f32 %v1605_v39, %v1537_v28  ;;  %v939_v54 = vadd.f32 %v907_v40, %v807_v19  ;;  %v1007_v61 = vmul.f32 %v1568_v46, %v3151_v55  ;;  %v1107_v57 = vmul.f32 %v1370_v37, %v3171_v9  ;;  %v1571_v18 = vld [vmem:[#allocation2 + $0x169] sm:$0xff] }
 0x14d   : > { %v1438_v34 = vadd.f32 %v1406_v23, %v1337_v33  ;;  %v1606_v41 = vmul.f32 %v3206_v36, %v1570_v20  ;;  %v1238_v27 = vadd.f32 %v1206_v5, %v1138_v45  ;;  %v1306_v48 = vmul.f32 %v1569_v4, %v3178_v14  ;;  %v1372_v40 = vld [vmem:[#allocation2 + $0x16f] sm:$0xff] }
 0x14e   : > { %v1676_v49 = vadd.f32 %v3267_v38, %v1637_v51  ;;  %v1039_v7 = vadd.f32 %v1007_v61, %v939_v54  ;;  %v808_v58 = vmul.f32 %v1369_v6, %v3139_v42  ;;  %v908_v39 = vmul.f32 %v1469_v53, %v3141_v43 }
 0x14f   : > { %v1538_v19 = vadd.f32 %v1506_v60, %v1438_v34  ;;  %v1338_v11 = vadd.f32 %v1306_v48, %v1238_v27  ;;  %v1407_v46 = vmul.f32 %v3190_v26, %v1371_v1  ;;  %v1207_v28 = vmul.f32 %v1470_v17, %v3173_v10  ;;  %v1472_v60 = vld [vmem:[#allocation2 + $0x170] sm:$0xff] }
 0x150   : > { %2720 = vmatprep.mubr.msk.f32.mxu1 %vm319_vm1, %v1676_v49  ;;  %v1139_v23 = vadd.f32 %v1107_v57, %v1039_v7  ;;  %v940_v33 = vadd.f32 %v908_v39, %v808_v58  ;;  %v1008_v45 = vmul.f32 %v1569_v4, %v3151_v55  ;;  %v1108_v5 = vmul.f32 %v1371_v1, %v3171_v9  ;;  %v1572_v7 = vld [vmem:[#allocation2 + $0x171] sm:$0xff] }
 0x151   : > { %v1638_v51 = vadd.f32 %v1606_v41, %v1538_v19  ;;  %v1439_v54 = vadd.f32 %v1407_v46, %v1338_v11  ;;  %v1507_v6 = vmul.f32 %v3185_v21, %v1471_v16  ;;  %v1607_v53 = vmul.f32 %v3206_v36, %v1571_v18 }
 0x152   : > { %v1239_v61 = vadd.f32 %v1207_v28, %v1139_v23  ;;  %v1307_v34 = vmul.f32 %v1570_v20, %v3178_v14  ;;  %v1040_v27 = vadd.f32 %v1008_v45, %v940_v33  ;;  %v809_v48 = vmul.f32 %v1370_v37, %v3139_v42  ;;  %v1373_v28 = vld [vmem:[#allocation2 + $0x187] sm:$0xff]  ;;  %v2837_v45 = vld [vmem:[%s3979_s5] sm:$0xf] }
 0x153   : > { %v1677_v57 = vadd.f32 %v3267_v38, %v1638_v51  ;;  %v1539_v49 = vadd.f32 %v1507_v6, %v1439_v54  ;;  %v1408_v4 = vmul.f32 %v3190_v26, %v1372_v40  ;;  %v909_v41 = vmul.f32 %v1470_v17, %v3141_v43 }
 0x154   : > { %v1339_v58 = vadd.f32 %v1307_v34, %v1239_v61  ;;  %v1508_v39 = vmul.f32 %v3185_v21, %v1472_v60  ;;  %v1140_v19 = vadd.f32 %v1108_v5, %v1040_v27  ;;  %v1208_v11 = vmul.f32 %v1471_v16, %v3173_v10  ;;  %v1573_v61 = vld [vmem:[#allocation2 + $0x189] sm:$0xff] }
 0x155   : > { %2721 = vmatmul.mubr.msk.f32.vlgmr.msra.gmra.mrb[0].mxu1 %vm319_vm1, %v1677_v57  ;;  %v1639_v46 = vadd.f32 %v1607_v53, %v1539_v49  ;;  %v941_v23 = vadd.f32 %v909_v41, %v809_v48  ;;  %v1009_v37 = vmul.f32 %v1570_v20, %v3151_v55  ;;  %v1109_v33 = vmul.f32 %v1372_v40, %v3171_v9  ;;  %v1473_v53 = vld [vmem:[#allocation2 + $0x188] sm:$0xff] }
 0x156   : > { %2745 = vmatpush3.msk.msra.mxu1 %vm416_vm0, %v2837_v45  ;;  %v1440_v17 = vadd.f32 %v1408_v4, %v1339_v58  ;;  %v1608_v5 = vmul.f32 %v3206_v36, %v1572_v7  ;;  %v1240_v51 = vadd.f32 %v1208_v11, %v1140_v19  ;;  %v1308_v54 = vmul.f32 %v1571_v18, %v3178_v14  ;;  %v1374_v41 = vld [vmem:[#allocation2 + $0x18f] sm:$0xff] }
 0x157   : > { %v1678_v6 = vadd.f32 %v3267_v38, %v1639_v46  ;;  %v1041_v34 = vadd.f32 %v1009_v37, %v941_v23  ;;  %v810_v20 = vmul.f32 %v1371_v1, %v3139_v42  ;;  %v910_v27 = vmul.f32 %v1471_v16, %v3141_v43  ;;  %v3712_v16 = vld [vmem:[%s3977_s3 + $0x8] ss:$0 sm:$0xff]  ;;  %v1474_v37 = vld [vmem:[#allocation2 + $0x190] sm:$0xff] }
 0x158   : > { %v1540_v48 = vadd.f32 %v1508_v39, %v1440_v17  ;;  %v1340_v57 = vadd.f32 %v1308_v54, %v1240_v51  ;;  %v1409_v49 = vmul.f32 %v3190_v26, %v1373_v28  ;;  %v1209_v4 = vmul.f32 %v1472_v60, %v3173_v10 }
 0x159   : > { %2723 = vmatprep.mubr.msk.f32.mxu1 %vm319_vm1, %v1678_v6  ;;  %v1141_v36 = vadd.f32 %v1109_v33, %v1041_v34  ;;  %v942_v58 = vadd.f32 %v910_v27, %v810_v20  ;;  %v1010_v19 = vmul.f32 %v1571_v18, %v3151_v55  ;;  %v1110_v11 = vmul.f32 %v1373_v28, %v3171_v9  ;;  %v1574_v6 = vld [vmem:[#allocation2 + $0x191] sm:$0xff] }
 0x15a   : > { %v1640_v46 = vadd.f32 %v1608_v5, %v1540_v48  ;;  %v1441_v23 = vadd.f32 %v1409_v49, %v1340_v57  ;;  %v1509_v1 = vmul.f32 %v3185_v21, %v1473_v53  ;;  %v1609_v39 = vmul.f32 %v3712_v16, %v1573_v61 }
 0x15b   : > { %v1241_v45 = vadd.f32 %v1209_v4, %v1141_v36  ;;  %v1309_v33 = vmul.f32 %v1572_v7, %v3178_v14  ;;  %v1042_v17 = vadd.f32 %v1010_v19, %v942_v58  ;;  %v811_v18 = vmul.f32 %v1372_v40, %v3139_v42  ;;  %v1375_v4 = vld [vmem:[#allocation2 + $0x1a7] sm:$0xff] }
 0x15c   : > { %v1679_v51 = vadd.f32 %v3267_v38, %v1640_v46  ;;  %v1541_v5 = vadd.f32 %v1509_v1, %v1441_v23  ;;  %v1410_v54 = vmul.f32 %v3190_v26, %v1374_v41  ;;  %v911_v34 = vmul.f32 %v1472_v60, %v3141_v43 }
 0x15d   : > { %v1341_v20 = vadd.f32 %v1309_v33, %v1241_v45  ;;  %v1510_v27 = vmul.f32 %v3185_v21, %v1474_v37  ;;  %v1142_v48 = vadd.f32 %v1110_v11, %v1042_v17  ;;  %v1210_v57 = vmul.f32 %v1473_v53, %v3173_v10  ;;  %v1475_v11 = vld [vmem:[#allocation2 + $0x1a8] sm:$0xff] }
 0x15e   : > { %2724 = vmatmul.mubr.msk.f32.gmra.mrb[2].mxu1 %vm319_vm1, %v1679_v51  ;;  %v1641_v49 = vadd.f32 %v1609_v39, %v1541_v5  ;;  %v943_v36 = vadd.f32 %v911_v34, %v811_v18  ;;  %v1011_v40 = vmul.f32 %v1572_v7, %v3151_v55  ;;  %v1111_v58 = vmul.f32 %v1374_v41, %v3171_v9  ;;  %v1575_v45 = vld [vmem:[#allocation2 + $0x1a9] sm:$0xff] }
 0x15f   : > { %v1442_v19 = vadd.f32 %v1410_v54, %v1341_v20  ;;  %v1610_v46 = vmul.f32 %v3712_v16, %v1574_v6  ;;  %v1242_v23 = vadd.f32 %v1210_v57, %v1142_v48  ;;  %v1310_v60 = vmul.f32 %v1573_v61, %v3178_v14  ;;  %v1376_v34 = vld [vmem:[#allocation2 + $0x1af] sm:$0xff] }
 0x160   : > { %v1680_v1 = vadd.f32 %v3267_v38, %v1641_v49  ;;  %v1043_v33 = vadd.f32 %v1011_v40, %v943_v36  ;;  %v812_v17 = vmul.f32 %v1373_v28, %v3139_v42  ;;  %v912_v39 = vmul.f32 %v1473_v53, %v3141_v43 }
 0x161   : > { %v1542_v18 = vadd.f32 %v1510_v27, %v1442_v19  ;;  %v1342_v51 = vadd.f32 %v1310_v60, %v1242_v23  ;;  %v1411_v7 = vmul.f32 %v3190_v26, %v1375_v4  ;;  %v1211_v5 = vmul.f32 %v1474_v37, %v3173_v10  ;;  %v1476_v27 = vld [vmem:[#allocation2 + $0x1b0] sm:$0xff] }
 0x162   : > { %2726 = vmatprep.mubr.msk.f32.mxu1 %vm319_vm1, %v1680_v1  ;;  %v1143_v54 = vadd.f32 %v1111_v58, %v1043_v33  ;;  %v944_v20 = vadd.f32 %v912_v39, %v812_v17  ;;  %v1012_v38 = vmul.f32 %v1573_v61, %v3151_v55  ;;  %v1112_v48 = vmul.f32 %v1375_v4, %v3171_v9  ;;  %v3742_v58 = vld [vmem:[%s3978_s4] ss:$0 sm:$0xff]  ;;  %v1576_v1 = vld [vmem:[#allocation2 + $0x1b1] sm:$0xff] }
 0x163   : > { %v1642_v57 = vadd.f32 %v1610_v46, %v1542_v18  ;;  %v1443_v49 = vadd.f32 %v1411_v7, %v1342_v51  ;;  %v1511_v28 = vmul.f32 %v3185_v21, %v1475_v11  ;;  %v1611_v53 = vmul.f32 %v3712_v16, %v1575_v45  ;;  %v1377_v7 = vld [vmem:[#allocation2 + $0x1c7] sm:$0xff] }
 0x164   : > { %v1243_v36 = vadd.f32 %v1211_v5, %v1143_v54  ;;  %v1311_v40 = vmul.f32 %v1574_v6, %v3178_v14  ;;  %v1044_v19 = vadd.f32 %v1012_v38, %v944_v20  ;;  %v813_v23 = vmul.f32 %v1374_v41, %v3139_v42 }
 0x165   : > { %v1681_v61 = vadd.f32 %v3742_v58, %v1642_v57  ;;  %v1543_v46 = vadd.f32 %v1511_v28, %v1443_v49  ;;  %v1412_v60 = vmul.f32 %v3190_v26, %v1376_v34  ;;  %v913_v33 = vmul.f32 %v1474_v37, %v3141_v43 }
 0x166   : > { %v1343_v17 = vadd.f32 %v1311_v40, %v1243_v36  ;;  %v1512_v39 = vmul.f32 %v3185_v21, %v1476_v27  ;;  %v1144_v18 = vadd.f32 %v1112_v48, %v1044_v19  ;;  %v1212_v51 = vmul.f32 %v1475_v11, %v3173_v10  ;;  %v1477_v48 = vld [vmem:[#allocation2 + $0x1c8] sm:$0xff] }
 0x167   : > { %2727 = vmatmul.mubr.msk.f32.gmra.mrb[4].mxu1 %vm319_vm1, %v1681_v61  ;;  %v1643_v41 = vadd.f32 %v1611_v53, %v1543_v46  ;;  %v945_v5 = vadd.f32 %v913_v33, %v813_v23  ;;  %v1013_v54 = vmul.f32 %v1574_v6, %v3151_v55  ;;  %v1113_v20 = vmul.f32 %v1376_v34, %v3171_v9  ;;  %v1577_v36 = vld [vmem:[#allocation2 + $0x1c9] sm:$0xff] }
 0x168   : > { %v1444_v38 = vadd.f32 %v1412_v60, %v1343_v17  ;;  %v1612_v57 = vmul.f32 %v3712_v16, %v1576_v1  ;;  %v1244_v49 = vadd.f32 %v1212_v51, %v1144_v18  ;;  %v1312_v37 = vmul.f32 %v1575_v45, %v3178_v14  ;;  %v1378_v33 = vld [vmem:[#allocation2 + $0x1cf] sm:$0xff] }
 0x169   : > { %v1682_v28 = vadd.f32 %v3742_v58, %v1643_v41  ;;  %v1045_v40 = vadd.f32 %v1013_v54, %v945_v5  ;;  %v814_v19 = vmul.f32 %v1375_v4, %v3139_v42  ;;  %v914_v53 = vmul.f32 %v1475_v11, %v3141_v43 }
 0x16a   : > { %v1544_v23 = vadd.f32 %v1512_v39, %v1444_v38  ;;  %v1344_v61 = vadd.f32 %v1312_v37, %v1244_v49  ;;  %v1413_v6 = vmul.f32 %v3190_v26, %v1377_v7  ;;  %v1213_v46 = vmul.f32 %v1476_v27, %v3173_v10  ;;  %v1478_v39 = vld [vmem:[#allocation2 + $0x1d0] sm:$0xff] }
 0x16b   : > { %2729 = vmatprep.mubr.msk.f32.mxu1 %vm319_vm1, %v1682_v28  ;;  %v1145_v60 = vadd.f32 %v1113_v20, %v1045_v40  ;;  %v946_v17 = vadd.f32 %v914_v53, %v814_v19  ;;  %v1014_v18 = vmul.f32 %v1575_v45, %v3151_v55  ;;  %v1114_v51 = vmul.f32 %v1377_v7, %v3171_v9  ;;  %v1578_v40 = vld [vmem:[#allocation2 + $0x1d1] sm:$0xff] }
 0x16c   : > { %v1644_v41 = vadd.f32 %v1612_v57, %v1544_v23  ;;  %v1445_v5 = vadd.f32 %v1413_v6, %v1344_v61  ;;  %v1513_v4 = vmul.f32 %v3185_v21, %v1477_v48  ;;  %v1613_v11 = vmul.f32 %v3712_v16, %v1577_v36 }
 0x16d   : > { %v1245_v54 = vadd.f32 %v1213_v46, %v1145_v60  ;;  %v1313_v38 = vmul.f32 %v1576_v1, %v3178_v14  ;;  %v1046_v49 = vadd.f32 %v1014_v18, %v946_v17  ;;  %v815_v37 = vmul.f32 %v1376_v34, %v3139_v42  ;;  %v1379_v46 = vld [vmem:[#allocation2 + $0x1e7] sm:$0xff] }
 0x16e   : > { %v1683_v20 = vadd.f32 %v3742_v58, %v1644_v41  ;;  %v1545_v28 = vadd.f32 %v1513_v4, %v1445_v5  ;;  %v1414_v45 = vmul.f32 %v3190_v26, %v1378_v33  ;;  %v915_v57 = vmul.f32 %v1476_v27, %v3141_v43 }
 0x16f   : > { %v1345_v19 = vadd.f32 %v1313_v38, %v1245_v54  ;;  %v1514_v53 = vmul.f32 %v3185_v21, %v1478_v39  ;;  %v1146_v23 = vadd.f32 %v1114_v51, %v1046_v49  ;;  %v1214_v61 = vmul.f32 %v1477_v48, %v3173_v10  ;;  %v1479_v51 = vld [vmem:[#allocation2 + $0x1e8] sm:$0xff] }
 0x170   : > { %2730 = vmatmul.mubr.msk.f32.gmra.mrb[6].mxu1 %vm319_vm1, %v1683_v20  ;;  %v1645_v6 = vadd.f32 %v1613_v11, %v1545_v28  ;;  %v947_v60 = vadd.f32 %v915_v57, %v815_v37  ;;  %v1015_v34 = vmul.f32 %v1576_v1, %v3151_v55  ;;  %v1115_v17 = vmul.f32 %v1378_v33, %v3171_v9  ;;  %v1579_v54 = vld [vmem:[#allocation2 + $0x1e9] sm:$0xff] }
 0x171   : > { %v1446_v18 = vadd.f32 %v1414_v45, %v1345_v19  ;;  %v1614_v41 = vmul.f32 %v3712_v16, %v1578_v40  ;;  %v1246_v5 = vadd.f32 %v1214_v61, %v1146_v23  ;;  %v1314_v27 = vmul.f32 %v1577_v36, %v3178_v14  ;;  %v1380_v57 = vld [vmem:[#allocation2 + $0x1ef] sm:$0xff] }
 0x172   : > { %v1684_v4 = vadd.f32 %v3742_v58, %v1645_v6  ;;  %v1047_v38 = vadd.f32 %v1015_v34, %v947_v60  ;;  %v816_v49 = vmul.f32 %v1377_v7, %v3139_v42  ;;  %v916_v11 = vmul.f32 %v1477_v48, %v3141_v43 }
 0x173   : > { %v1546_v37 = vadd.f32 %v1514_v53, %v1446_v18  ;;  %v1346_v20 = vadd.f32 %v1314_v27, %v1246_v5  ;;  %v1415_v1 = vmul.f32 %v3190_v26, %v1379_v46  ;;  %v1215_v28 = vmul.f32 %v1478_v39, %v3173_v10  ;;  %v1480_v53 = vld [vmem:[#allocation2 + $0x1f0] sm:$0xff] }
 0x174   : > { %2732 = vmatprep.mubr.msk.f32.mxu1 %vm319_vm1, %v1684_v4  ;;  %v1147_v45 = vadd.f32 %v1115_v17, %v1047_v38  ;;  %v948_v19 = vadd.f32 %v916_v11, %v816_v49  ;;  %v1016_v23 = vmul.f32 %v1577_v36, %v3151_v55  ;;  %v1116_v61 = vmul.f32 %v1379_v46, %v3171_v9  ;;  %v1580_v38 = vld [vmem:[#allocation2 + $0x1f1] sm:$0xff] }
 0x175   : > { %v1646_v6 = vadd.f32 %v1614_v41, %v1546_v37  ;;  %v1447_v60 = vadd.f32 %v1415_v1, %v1346_v20  ;;  %v1515_v7 = vmul.f32 %v3185_v21, %v1479_v51  ;;  %v1615_v48 = vmul.f32 %v3712_v16, %v1579_v54 }
 0x176   : > { %v1247_v34 = vadd.f32 %v1215_v28, %v1147_v45  ;;  %v1315_v18 = vmul.f32 %v1578_v40, %v3178_v14  ;;  %v1048_v5 = vadd.f32 %v1016_v23, %v948_v19  ;;  %v817_v27 = vmul.f32 %v1378_v33, %v3139_v42  ;;  %v1381_v28 = vld [vmem:[#allocation2 + $0x207] sm:$0xff] }
 0x177   : > { %v1685_v17 = vadd.f32 %v3742_v58, %v1646_v6  ;;  %v1547_v4 = vadd.f32 %v1515_v7, %v1447_v60  ;;  %v1416_v36 = vmul.f32 %v3190_v26, %v1380_v57  ;;  %v917_v41 = vmul.f32 %v1478_v39, %v3141_v43 }
 0x178   : > { %v1347_v49 = vadd.f32 %v1315_v18, %v1247_v34  ;;  %v1516_v11 = vmul.f32 %v3185_v21, %v1480_v53  ;;  %v1148_v37 = vadd.f32 %v1116_v61, %v1048_v5  ;;  %v1216_v20 = vmul.f32 %v1479_v51, %v3173_v10  ;;  %v1481_v61 = vld [vmem:[#allocation2 + $0x208] sm:$0xff] }
 0x179   : > { %2733 = vmatmul.mubr.msk.f32.gmra.mrb[8].mxu1 %vm319_vm1, %v1685_v17  ;;  %v1647_v1 = vadd.f32 %v1615_v48, %v1547_v4  ;;  %v949_v45 = vadd.f32 %v917_v41, %v817_v27  ;;  %v1017_v33 = vmul.f32 %v1578_v40, %v3151_v55  ;;  %v1117_v19 = vmul.f32 %v1380_v57, %v3171_v9  ;;  %v1581_v34 = vld [vmem:[#allocation2 + $0x209] sm:$0xff] }
 0x17a   : > { %v1448_v23 = vadd.f32 %v1416_v36, %v1347_v49  ;;  %v1616_v6 = vmul.f32 %v3712_v16, %v1580_v38  ;;  %v1248_v60 = vadd.f32 %v1216_v20, %v1148_v37  ;;  %v1316_v39 = vmul.f32 %v1579_v54, %v3178_v14  ;;  %v1382_v41 = vld [vmem:[#allocation2 + $0x20f] sm:$0xff] }
 0x17b   : > { %v1686_v7 = vadd.f32 %v3742_v58, %v1647_v1  ;;  %v1049_v18 = vadd.f32 %v1017_v33, %v949_v45  ;;  %v818_v5 = vmul.f32 %v1379_v46, %v3139_v42  ;;  %v918_v48 = vmul.f32 %v1479_v51, %v3141_v43 }
 0x17c   : > { %v1548_v27 = vadd.f32 %v1516_v11, %v1448_v23  ;;  %v1348_v17 = vadd.f32 %v1316_v39, %v1248_v60  ;;  %v1417_v40 = vmul.f32 %v3190_v26, %v1381_v28  ;;  %v1217_v4 = vmul.f32 %v1480_v53, %v3173_v10  ;;  %v1482_v11 = vld [vmem:[#allocation2 + $0x210] sm:$0xff] }
 0x17d   : > { %2735 = vmatprep.mubr.msk.f32.mxu1 %vm319_vm1, %v1686_v7  ;;  %v1149_v36 = vadd.f32 %v1117_v19, %v1049_v18  ;;  %v950_v49 = vadd.f32 %v918_v48, %v818_v5  ;;  %v1018_v37 = vmul.f32 %v1579_v54, %v3151_v55  ;;  %v1118_v20 = vmul.f32 %v1381_v28, %v3171_v9  ;;  %v1383_v18 = vld [vmem:[#allocation2 + $0x227] sm:$0xff] }
 0x17e   : > { %v1648_v1 = vadd.f32 %v1616_v6, %v1548_v27  ;;  %v1449_v45 = vadd.f32 %v1417_v40, %v1348_v17  ;;  %v1517_v46 = vmul.f32 %v3185_v21, %v1481_v61  ;;  %v1617_v51 = vmul.f32 %v3712_v16, %v1581_v34  ;;  %v1582_v40 = vld [vmem:[#allocation2 + $0x211] sm:$0xff] }
 0x17f   : > { %v1249_v33 = vadd.f32 %v1217_v4, %v1149_v36  ;;  %v1317_v23 = vmul.f32 %v1580_v38, %v3178_v14  ;;  %v1050_v60 = vadd.f32 %v1018_v37, %v950_v49  ;;  %v819_v39 = vmul.f32 %v1380_v57, %v3139_v42  ;;  %v1483_v4 = vld [vmem:[#allocation2 + $0x228] sm:$0xff] }
 0x180   : > { %v1687_v19 = vadd.f32 %v3742_v58, %v1648_v1  ;;  %v1549_v7 = vadd.f32 %v1517_v46, %v1449_v45  ;;  %v1418_v54 = vmul.f32 %v3190_v26, %v1382_v41  ;;  %v919_v28 = vmul.f32 %v1480_v53, %v3141_v43  ;;  %v1583_v1 = vld [vmem:[#allocation2 + $0x229] sm:$0xff] }
 0x181   : > { %v1349_v6 = vadd.f32 %v1317_v23, %v1249_v33  ;;  %v1518_v5 = vmul.f32 %v3185_v21, %v1482_v11  ;;  %v1150_v48 = vadd.f32 %v1118_v20, %v1050_v60  ;;  %v1218_v27 = vmul.f32 %v1481_v61, %v3173_v10  ;;  %v1384_v23 = vld [vmem:[#allocation2 + $0x22f] sm:$0xff] }
 0x182   : > { %2736 = vmatmul.mubr.msk.f32.gmra.mrb[10].mxu1 %vm319_vm1, %v1687_v19  ;;  %v1649_v17 = vadd.f32 %v1617_v51, %v1549_v7  ;;  %v951_v42 = vadd.f32 %v919_v28, %v819_v39  ;;  %v1019_v57 = vmul.f32 %v1580_v38, %v3151_v55  ;;  %v1119_v36 = vmul.f32 %v1382_v41, %v3171_v9  ;;  %v1484_v60 = vld [vmem:[#allocation2 + $0x230] sm:$0xff] }
 0x183   : > { %v1450_v49 = vadd.f32 %v1418_v54, %v1349_v6  ;;  %v1250_v37 = vadd.f32 %v1218_v27, %v1150_v48  ;;  %v1318_v43 = vmul.f32 %v1581_v34, %v3178_v14  ;;  %v1419_v53 = vmul.f32 %v3190_v26, %v1383_v18  ;;  %v1584_v28 = vld [vmem:[#allocation2 + $0x231] sm:$0xff] }
 0x184   : > { %v1688_v20 = vadd.f32 %v3742_v58, %v1649_v17  ;;  %v1051_v61 = vadd.f32 %v1019_v57, %v951_v42  ;;  %v1618_v46 = vmul.f32 %v3712_v16, %v1582_v40  ;;  %v1519_v33 = vmul.f32 %v3185_v21, %v1483_v4 }
 0x185   : > { %v1550_v45 = vadd.f32 %v1518_v5, %v1450_v49  ;;  %v1350_v51 = vadd.f32 %v1318_v43, %v1250_v37  ;;  %v1219_v9 = vmul.f32 %v1482_v11, %v3173_v10  ;;  %v1619_v41 = vmul.f32 %v3712_v16, %v1583_v1 }
 0x186   : > { %2738 = vmatprep.mubr.msk.f32.mxu1 %vm319_vm1, %v1688_v20  ;;  %v1151_v55 = vadd.f32 %v1119_v36, %v1051_v61  ;;  %v1319_v19 = vmul.f32 %v1582_v40, %v3178_v14  ;;  %v1420_v7 = vmul.f32 %v3190_v26, %v1384_v23  ;;  %v1520_v5 = vmul.f32 %v3185_v21, %v1484_v60  ;;  %v4006_v21 = vld [vmem:[#allocation10_spill] sm:$0xff] }
 0x187   : > { %v1650_v38 = vadd.f32 %v1618_v46, %v1550_v45  ;;  %v1451_v34 = vadd.f32 %v1419_v53, %v1350_v51  ;;  %v1620_v48 = vmul.f32 %v3712_v16, %v1584_v28 }
 0x188   : > { %v1251_v39 = vadd.f32 %v1219_v9, %v1151_v55 }
 0x189   : > { %v1689_v54 = vadd.f32 %v3742_v58, %v1650_v38  ;;  %v1551_v18 = vadd.f32 %v1519_v33, %v1451_v34 }
 0x18a   : > { %v1351_v6 = vadd.f32 %v1319_v19, %v1251_v39 }
 0x18b   : > { %2739 = vmatmul.mubr.msk.f32.gmra.mrb[12].mxu1 %vm319_vm1, %v1689_v54  ;;  %v1651_v10 = vadd.f32 %v1619_v41, %v1551_v18 }
 0x18c   : > { %v1452_v11 = vadd.f32 %v1420_v7, %v1351_v6 }
 0x18d   : > { %v1690_v27 = vadd.f32 %v3742_v58, %v1651_v10 }
 0x18e   : > { %v1552_v17 = vadd.f32 %v1520_v5, %v1452_v11 }
 0x18f   : > { %2741 = vmatprep.mubr.msk.f32.mxu1 %vm319_vm1, %v1690_v27 }
 0x190   : > { %v1652_v14 = vadd.f32 %v1620_v48, %v1552_v17 }
 0x192   : > { %v1691_v26 = vadd.f32 %v3742_v58, %v1652_v14 }
 0x194   : > { %2742 = vmatmul.mubr.msk.f32.gmra.mrb[14].mxu1 %vm319_vm1, %v1691_v26 }
 0x195   : > { %2746 = vmatprep.mubr.msk.f32.mxu1 %vm319_vm1, %v3147_v52  ;;  %v4001_v52 = vld [vmem:[#allocation3_spill] sm:$0xff] }
 0x198   : > { %2747 = vmatmul.mubr.msk.f32.vlgmr.msra.gmra.mrb[16].mxu1 %vm319_vm1, %v3144_v50  ;;  %v4000_v50 = vld [vmem:[#allocation4_spill] sm:$0xff] }
 0x199   : > { %2749 = vmatprep.mubr.msk.f32.mxu1 %vm319_vm1, %v3163_v2  ;;  %v4003_v2 = vld [vmem:[#allocation5_spill] sm:$0xff] }
 0x19c   : > { %2750 = vmatmul.mubr.msk.f32.gmra.mrb[18].mxu1 %vm319_vm1, %v3160_v63  ;;  %v4002_v63 = vld [vmem:[#allocation6_spill] sm:$0xff] }
 0x19d   : > { %2752 = vmatprep.mubr.msk.f32.mxu1 %vm319_vm1, %v3181_v15  ;;  %v4005_v15 = vld [vmem:[#allocation7_spill] sm:$0xff] }
 0x1a0   : > { %2753 = vmatmul.mubr.msk.f32.gmra.mrb[20].mxu1 %vm319_vm1, %v3176_v12  ;;  %v4004_v12 = vld [vmem:[#allocation8_spill] sm:$0xff] }
 0x1a1   : > { %2755 = vmatprep.mubr.msk.f32.mxu1 %vm319_vm1, %v3201_v35  ;;  %v4008_v35 = vld [vmem:[#allocation11_spill] sm:$0xff] }
 0x1a4   : > { %2756 = vmatmul.mubr.msk.f32.gmra.mrb[22].mxu1 %vm319_vm1, %v3195_v30  ;;  %v4007_v30 = vld [vmem:[#allocation9_spill] sm:$0xff] }
 0x1a5   : > { %2758 = vmatprep.mubr.msk.f32.mxu1 %vm319_vm1, %v3234_v3 }
 0x1a8   : > { %2759 = vmatmul.mubr.msk.f32.gmra.mrb[24].mxu1 %vm319_vm1, %v3229_v59 }
 0x1a9   : > { %2761 = vmatprep.mubr.msk.f32.mxu1 %vm319_vm1, %v3259_v32 }
 0x1ac   : > { %2762 = vmatmul.mubr.msk.f32.gmra.mrb[26].mxu1 %vm319_vm1, %v3253_v24 }
 0x1ad   : > { %2764 = vmatprep.mubr.msk.f32.mxu1 %vm319_vm1, %v3289_v8 }
 0x1b0   : > { %2765 = vmatmul.mubr.msk.f32.gmra.mrb[28].mxu1 %vm319_vm1, %v3284_v62 }
 0x1b1   : > { %2767 = vmatprep.mubr.msk.f32.mxu1 %vm319_vm1, %v3317_v44 }
 0x1b4   : > { %2768 = vmatmul.mubr.msk.f32.gmra.mrb[30].mxu1 %vm319_vm1, %v3311_v31 }
 0x1b5   : > { %2770 = vmatprep.mubr.msk.f32.mxu1 %vm319_vm1, %v3347_v0 }
 0x1b8   : > { %2771 = vmatmul.mubr.msk.f32.gmra.mrb[0].mxu1 %vm319_vm1, %v3337_v56 }
 0x1b9   : > { %2773 = vmatprep.mubr.msk.f32.mxu1 %vm319_vm1, %v4000_v50 }
 0x1bc   : > { %2774 = vmatmul.mubr.msk.f32.gmra.mrb[2].mxu1 %vm319_vm1, %v4001_v52 }
 0x1bd   : > { %2776 = vmatprep.mubr.msk.f32.mxu1 %vm319_vm1, %v4002_v63 }
 0x1c0   : > { %2777 = vmatmul.mubr.msk.f32.gmra.mrb[4].mxu1 %vm319_vm1, %v4003_v2 }
 0x1c1   : > { %2779 = vmatprep.mubr.msk.f32.mxu1 %vm319_vm1, %v4004_v12 }
 0x1c4   : > { %2780 = vmatmul.mubr.msk.f32.gmra.mrb[6].mxu1 %vm319_vm1, %v4005_v15 }
 0x1c5   : > { %2782 = vmatprep.mubr.msk.f32.mxu1 %vm319_vm1, %v4006_v21 }
 0x1c8   : > { %2783 = vmatmul.mubr.msk.f32.gmra.mrb[8].mxu1 %vm319_vm1, %v4007_v30 }
 0x1c9   : > { %2785 = vmatprep.mubr.msk.f32.mxu1 %vm319_vm1, %v3562_v25 }
 0x1cc   : > { %2786 = vmatmul.mubr.msk.f32.gmra.mrb[10].mxu1 %vm319_vm1, %v4008_v35 }
 0x1cd   : > { %2788 = vmatprep.mubr.msk.f32.mxu1 %vm319_vm1, %v3600_v13 }
 0x1d0   : > { %2789 = vmatmul.mubr.msk.f32.gmra.mrb[12].mxu1 %vm319_vm1, %v3582_v22 }
 0x1d1   : > { %2791 = vmatprep.mubr.msk.f32.mxu1 %vm319_vm1, %v3637_v29 }
 0x1d4   : > { %2792 = vmatmul.mubr.msk.f32.gmra.mrb[14].mxu1 %vm319_vm1, %v3619_v47 }
 0x1d9   : > { %v2698_v59 = vpop.f32.mrb[32].mxu0 }
 0x1da   : > { %v1859_v3 = vpop.f32.mrb[33].mxu0 }
 0x1df   : > { %v2701_v24 = vpop.f32.mrb[34].mxu0 }
 0x1e0   : > { %v1869_v32 = vpop.f32.mrb[35].mxu0 }
 0x1ed   : > { %v2704_v62 = vpop.f32.mrb[36].mxu0 }
 0x1ee   : > { %v1879_v8 = vpop.f32.mrb[37].mxu0 }
 0x1f7   : > { %v2707_v31 = vpop.f32.mrb[38].mxu0 }
 0x1f8   : > { %v1889_v44 = vpop.f32.mrb[39].mxu0 }
 0x201   : > { %v2710_v56 = vpop.f32.mrb[40].mxu0 }
 0x202   : > { %v1899_v0 = vpop.f32.mrb[41].mxu0 }
 0x20b   : > { %v2713_v25 = vpop.f32.mrb[42].mxu0 }
 0x20c   : > { %v1909_v13 = vpop.f32.mrb[43].mxu0 }
 0x215   : > { %v2716_v22 = vpop.f32.mrb[44].mxu0 }
 0x216   : > { %v1919_v16 = vpop.f32.mrb[45].mxu0 }
 0x21f   : > { %v2719_v58 = vpop.f32.mrb[46].mxu0 }
 0x220   : > { %v1929_v29 = vpop.f32.mrb[47].mxu0 }
 0x26b   : > { %v2748_v47 = vpop.f32.mrb[16].mxu1 }
 0x26c   : > { %v2189_v40 = vadd.f32 %v2748_v47, %v2698_v59  ;;  %v2183_v4 = vpop.f32.mrb[17].mxu1 }
 0x26d   : > { %v2184_v42 = vadd.f32 %v2183_v4, %v1859_v3 }
 0x26e   : > { %2344 = vst.msk [vmem:[%s3905_s9 + $0x8] sm:$0xff] %vm2342_vm2, %v2189_v40 }
 0x26f   : > { %2343 = vst.msk [vmem:[%s3905_s9] sm:$0xff] %vm2342_vm2, %v2184_v42  ;;  %v2751_v57 = vpop.f32.mrb[18].mxu1 }
 0x270   : > { %v2199_v36 = vadd.f32 %v2751_v57, %v2701_v24  ;;  %v2193_v49 = vpop.f32.mrb[19].mxu1 }
 0x271   : > { %v2194_v37 = vadd.f32 %v2193_v49, %v1869_v32 }
 0x272   : > { %2346 = vst.msk [vmem:[%s3905_s9 + $0x18] sm:$0xff] %vm2342_vm2, %v2199_v36 }
 0x273   : > { %2345 = vst.msk [vmem:[%s3905_s9 + $0x10] sm:$0xff] %vm2342_vm2, %v2194_v37  ;;  %v2754_v43 = vpop.f32.mrb[20].mxu1 }
 0x274   : > { %v2209_v53 = vadd.f32 %v2754_v43, %v2704_v62  ;;  %v2203_v20 = vpop.f32.mrb[21].mxu1 }
 0x275   : > { %v2204_v1 = vadd.f32 %v2203_v20, %v1879_v8 }
 0x276   : > { %2348 = vst.msk [vmem:[%s3905_s9 + $0x28] sm:$0xff] %vm2342_vm2, %v2209_v53 }
 0x277   : > { %2347 = vst.msk [vmem:[%s3905_s9 + $0x20] sm:$0xff] %vm2342_vm2, %v2204_v1  ;;  %v2757_v61 = vpop.f32.mrb[22].mxu1 }
 0x278   : > { %v2219_v45 = vadd.f32 %v2757_v61, %v2707_v31  ;;  %v2213_v46 = vpop.f32.mrb[23].mxu1 }
 0x279   : > { %v2214_v51 = vadd.f32 %v2213_v46, %v1889_v44 }
 0x27a   : > { %2350 = vst.msk [vmem:[%s3905_s9 + $0x38] sm:$0xff] %vm2342_vm2, %v2219_v45 }
 0x27b   : > { %2349 = vst.msk [vmem:[%s3905_s9 + $0x30] sm:$0xff] %vm2342_vm2, %v2214_v51  ;;  %v2760_v33 = vpop.f32.mrb[24].mxu1 }
 0x27c   : > { %v2229_v23 = vadd.f32 %v2760_v33, %v2710_v56  ;;  %v2223_v55 = vpop.f32.mrb[25].mxu1 }
 0x27d   : > { %v2224_v9 = vadd.f32 %v2223_v55, %v1899_v0 }
 0x27e   : > { %2352 = vst.msk [vmem:[%s3905_s9 + $0x48] sm:$0xff] %vm2342_vm2, %v2229_v23 }
 0x27f   : > { %2351 = vst.msk [vmem:[%s3905_s9 + $0x40] sm:$0xff] %vm2342_vm2, %v2224_v9  ;;  %v2763_v38 = vpop.f32.mrb[26].mxu1 }
 0x280   : > { %v2239_v34 = vadd.f32 %v2763_v38, %v2713_v25  ;;  %v2233_v41 = vpop.f32.mrb[27].mxu1 }
 0x281   : > { %v2234_v60 = vadd.f32 %v2233_v41, %v1909_v13 }
 0x282   : > { %2354 = vst.msk [vmem:[%s3905_s9 + $0x58] sm:$0xff] %vm2342_vm2, %v2239_v34 }
 0x283   : > { %2353 = vst.msk [vmem:[%s3905_s9 + $0x50] sm:$0xff] %vm2342_vm2, %v2234_v60  ;;  %v2766_v39 = vpop.f32.mrb[28].mxu1 }
 0x284   : > { %v2249_v19 = vadd.f32 %v2766_v39, %v2716_v22  ;;  %v2243_v7 = vpop.f32.mrb[29].mxu1 }
 0x285   : > { %v2244_v54 = vadd.f32 %v2243_v7, %v1919_v16 }
 0x286   : > { %2356 = vst.msk [vmem:[%s3905_s9 + $0x68] sm:$0xff] %vm2342_vm2, %v2249_v19 }
 0x287   : > { %2355 = vst.msk [vmem:[%s3905_s9 + $0x60] sm:$0xff] %vm2342_vm2, %v2244_v54  ;;  %v2769_v18 = vpop.f32.mrb[30].mxu1 }
 0x288   : > { %v2259_v28 = vadd.f32 %v2769_v18, %v2719_v58  ;;  %v2253_v6 = vpop.f32.mrb[31].mxu1 }
 0x289   : > { %v2254_v5 = vadd.f32 %v2253_v6, %v1929_v29 }
 0x28a   : > { %2358 = vst.msk [vmem:[%s3905_s9 + $0x78] sm:$0xff] %vm2342_vm2, %v2259_v28 }
 0x28b   : > { %2357 = vst.msk [vmem:[%s3905_s9 + $0x70] sm:$0xff] %vm2342_vm2, %v2254_v5  ;;  %v2772_v10 = vpop.f32.mrb[0].mxu1 }
 0x28c   : > { %2360 = vst.msk [vmem:[%s3905_s9 + $0x88] sm:$0xff] %vm2342_vm2, %v2772_v10  ;;  %v2263_v11 = vpop.f32.mrb[1].mxu1 }
 0x28d   : > { %2359 = vst.msk [vmem:[%s3905_s9 + $0x80] sm:$0xff] %vm2342_vm2, %v2263_v11 }
 0x28f   : > { %v2775_v48 = vpop.f32.mrb[2].mxu1 }
 0x290   : > { %2362 = vst.msk [vmem:[%s3905_s9 + $0x98] sm:$0xff] %vm2342_vm2, %v2775_v48  ;;  %v2273_v27 = vpop.f32.mrb[3].mxu1 }
 0x291   : > { %2361 = vst.msk [vmem:[%s3905_s9 + $0x90] sm:$0xff] %vm2342_vm2, %v2273_v27 }
 0x293   : > { %v2778_v17 = vpop.f32.mrb[4].mxu1 }
 0x294   : > { %2364 = vst.msk [vmem:[%s3905_s9 + $0xa8] sm:$0xff] %vm2342_vm2, %v2778_v17  ;;  %v2283_v14 = vpop.f32.mrb[5].mxu1 }
 0x295   : > { %2363 = vst.msk [vmem:[%s3905_s9 + $0xa0] sm:$0xff] %vm2342_vm2, %v2283_v14 }
 0x297   : > { %v2781_v26 = vpop.f32.mrb[6].mxu1 }
 0x298   : > { %2366 = vst.msk [vmem:[%s3905_s9 + $0xb8] sm:$0xff] %vm2342_vm2, %v2781_v26  ;;  %v2293_v50 = vpop.f32.mrb[7].mxu1 }
 0x299   : > { %2365 = vst.msk [vmem:[%s3905_s9 + $0xb0] sm:$0xff] %vm2342_vm2, %v2293_v50 }
 0x29b   : > { %v2784_v52 = vpop.f32.mrb[8].mxu1 }
 0x29c   : > { %2368 = vst.msk [vmem:[%s3905_s9 + $0xc8] sm:$0xff] %vm2342_vm2, %v2784_v52  ;;  %v2303_v63 = vpop.f32.mrb[9].mxu1 }
 0x29d   : > { %2367 = vst.msk [vmem:[%s3905_s9 + $0xc0] sm:$0xff] %vm2342_vm2, %v2303_v63 }
 0x29f   : > { %v2787_v2 = vpop.f32.mrb[10].mxu1 }
 0x2a0   : > { %2370 = vst.msk [vmem:[%s3905_s9 + $0xd8] sm:$0xff] %vm2342_vm2, %v2787_v2  ;;  %v2313_v12 = vpop.f32.mrb[11].mxu1 }
 0x2a1   : > { %2369 = vst.msk [vmem:[%s3905_s9 + $0xd0] sm:$0xff] %vm2342_vm2, %v2313_v12 }
 0x2a3   : > { %v2790_v15 = vpop.f32.mrb[12].mxu1 }
 0x2a4   : > { %2372 = vst.msk [vmem:[%s3905_s9 + $0xe8] sm:$0xff] %vm2342_vm2, %v2790_v15  ;;  %v2323_v21 = vpop.f32.mrb[13].mxu1 }
 0x2a5   : > { %2371 = vst.msk [vmem:[%s3905_s9 + $0xe0] sm:$0xff] %vm2342_vm2, %v2323_v21 }
 0x2a7   : > { %v2793_v30 = vpop.f32.mrb[14].mxu1 }
 0x2a8   : > { %2374 = vst.msk [vmem:[%s3905_s9 + $0xf8] sm:$0xff] %vm2342_vm2, %v2793_v30  ;;  %v2333_v35 = vpop.f32.mrb[15].mxu1 }
 0x2a9   : > { %2373 = vst.msk [vmem:[%s3905_s9 + $0xf0] sm:$0xff] %vm2342_vm2, %v2333_v35 }
 0x2aa PF: > { %s17_s24 = sadd.s32 1, %s2846_s24  }
 0x2ab   : > { %p14_p4 = scmp.ge.s32.totalorder %s17_s24, 4  }
 0x2ad   :  { %16 = sbr.rel (!%p14_p4) target bundleno = 1 (0x1), region = 80 }

</bundles_post_ra>
